<compile_context>
chip_gen: v7x
topology: tpu7x:2x2x1
jax: 0.10.0
libtpu: 0.0.40
codegen_flags: <defaults>
</compile_context>

<pallas_src>
import functools

import jax
import jax.numpy as jnp
from jax.experimental import pallas as pl
from jax.experimental.pallas import tpu as pltpu

NEG_SLOPE = 0.01   # nn.LeakyReLU default
BN_EPS = 1e-5      # nn.BatchNorm3d default


def _leaky(a):
    # leaky_relu: max(a, slope*a) is exact for slope in (0, 1)
    return jnp.maximum(a, NEG_SLOPE * a)


def _sep_conv3d_kernel(xt_ref,                         # (12*C, THW) pre-shifted taps
                       w133_ref, w311_ref,             # (Cout, 9*C), (Cout, 3*C) BN-folded
                       w111a_ref, w111b_ref,           # (Cout, Cout) BN-folded
                       b133_ref, b311_ref, b111_ref,   # (Cout, 1) BN-folded
                       bns_ref, bnb_ref,               # (Cout, 1) final BN affine
                       o_ref,                          # (Cout, THW) output block
                       *, C, Cout, THW):
    # ---- hoist all (tiny) weight / bias loads up front --------------------
    w133 = w133_ref[...]
    w311 = w311_ref[...]
    w111a = w111a_ref[...]
    w111b = w111b_ref[...]
    b133 = b133_ref[...]
    b311 = b311_ref[...]
    b111 = b111_ref[...]
    bns = bns_ref[...]
    bnb = bnb_ref[...]

    # ---- conv3d (1,3,3), replicate pad (0,1,1); BN already folded ----------
    # tap rows g*C+ci hold the (kh,kw)=(g//3,g%3)-shifted, lane-dense window.
    acc1 = jnp.zeros((Cout, THW), jnp.float32)
    for g in range(9):
        slab = xt_ref[g * C:(g + 1) * C, :]                     # (C, THW)
        for ci in range(C):
            j = g * C + ci
            acc1 = acc1 + w133[:, j:j + 1] * slab[ci:ci + 1, :]
    e1 = _leaky(acc1 + b133)

    # fold e1 into the 1x1x1 conv accumulator right away (frees e1 early)
    acc3 = jnp.zeros((Cout, THW), jnp.float32)
    for cp in range(Cout):
        acc3 = acc3 + w111a[:, cp:cp + 1] * e1[cp:cp + 1, :]

    # ---- conv3d (3,1,1), replicate pad (1,0,0); BN already folded ----------
    slab_dm = xt_ref[9 * C:10 * C, :]    # input[d-1] (clamped)
    slab_dp = xt_ref[10 * C:11 * C, :]   # input[d+1] (clamped)
    slab_x = xt_ref[11 * C:12 * C, :]    # original input (also the residual)

    acc2 = jnp.zeros((Cout, THW), jnp.float32)
    for kd, slab in ((0, slab_dm), (1, slab_x), (2, slab_dp)):
        for ci in range(C):
            j = kd * C + ci
            acc2 = acc2 + w311[:, j:j + 1] * slab[ci:ci + 1, :]
    e2 = _leaky(acc2 + b311)

    for cp in range(Cout):
        acc3 = acc3 + w111b[:, cp:cp + 1] * e2[cp:cp + 1, :]
    e3 = _leaky(acc3 + b111)

    # ---- residual + final (eval-mode) BN + LeakyReLU; lane-dense store -----
    o_ref[...] = _leaky(bns * (e3 + slab_x) + bnb)


def _pick_d_tile(D, H, W, C, Cout, budget_bytes=20 * 1024 * 1024):
    """Largest D-tile whose (double-buffered) VMEM footprint fits the budget.

    Budget is conservative so the same choice is safe under v7x's 64 MiB VMEM
    (32 MiB scoped default); v5e/v6e simply also fit.
    """
    hw = H * W
    for t in range(D, 0, -1):
        if D % t:
            continue
        if (D // t) > 1 and (t * hw) % 128:
            continue
        thw = t * hw
        # 2x input block + 2x output block + ~8 live (Cout, THW) intermediates
        footprint = (2 * 12 * C * thw + 2 * Cout * thw + 8 * Cout * thw) * 4
        if footprint <= budget_bytes:
            return t
    return 1


def seperate_conv3d(x, params, *, d_tile=None):
    """x: (N, C, D, H, W) float32, PyTorch NCDHW layout."""
    x = x.astype(jnp.float32)
    N, C, D, H, W = x.shape
    Cout = params["w133"].shape[0]
    if C != Cout:
        raise ValueError("SeperateConv3D residual (e3 + input) needs in_ch == out_ch")

    HW = H * W
    TD = d_tile if d_tile is not None else _pick_d_tile(D, H, W, C, Cout)
    if D % TD != 0:
        raise ValueError("d_tile must divide D")
    n_dt = D // TD
    if n_dt > 1 and (TD * HW) % 128 != 0:
        raise ValueError("TD*H*W must be a multiple of 128 when tiling over D")
    THW = TD * HW

    # ---- eval-mode BatchNorm folded to per-channel affine, then into convs --
    s = params["bn_gamma"] * jax.lax.rsqrt(params["bn_var"] + BN_EPS)
    t = params["bn_beta"] - params["bn_mean"] * s

    # (Cout, 9*C): column g*C + ci = w133[o, ci, kh, kw] * s[o], g = kh*3+kw
    w133f = jnp.transpose(params["w133"] * s[:, None, None, None],
                          (0, 2, 3, 1)).reshape(Cout, 9 * C)
    # (Cout, 3*C): column kd*C + ci = w311[o, ci, kd] * s[o]
    w311f = jnp.transpose(params["w311"] * s[:, None, None],
                          (0, 2, 1)).reshape(Cout, 3 * C)
    w111af = params["w111a"] * s[:, None]
    w111bf = params["w111b"] * s[:, None]
    b133f = (params["b133"] * s + t).reshape(Cout, 1)
    b311f = (params["b311"] * s + t).reshape(Cout, 1)
    b111f = (params["b111"] * s + t).reshape(Cout, 1)
    bns = s.reshape(Cout, 1)
    bnb = t.reshape(Cout, 1)

    # ---- pre-shifted, lane-dense tap slabs (built once, outside the kernel) --
    # groups 0..8 : replicate-padded (kh,kw)-shifted HxW windows
    # group  9    : input[d-1] (replicate-clamped)
    # group 10    : input[d+1] (replicate-clamped)
    # group 11    : original input (residual + (3,1,1) center tap)
    xph = jnp.pad(x, ((0, 0), (0, 0), (0, 0), (1, 1), (1, 1)), mode="edge")
    groups = [xph[:, :, :, kh:kh + H, kw:kw + W]
              for kh in range(3) for kw in range(3)]
    xpd = jnp.pad(x, ((0, 0), (0, 0), (1, 1), (0, 0), (0, 0)), mode="edge")
    groups.append(xpd[:, :, 0:D])
    groups.append(xpd[:, :, 2:D + 2])
    groups.append(x)
    xt = jnp.stack(groups, axis=1).reshape(N, 12 * C, D * HW)

    kernel = functools.partial(_sep_conv3d_kernel, C=C, Cout=Cout, THW=THW)

    def full_spec(arr):
        nd = arr.ndim
        return pl.BlockSpec(arr.shape, lambda b, d, _nd=nd: (0,) * _nd)

    out_flat = pl.pallas_call(
        kernel,
        out_shape=jax.ShapeDtypeStruct((N, Cout, D * HW), jnp.float32),
        grid=(N, n_dt),
        in_specs=[
            # one contiguous lane-dense block per (batch, D-tile); BlockSpec
            # auto-pipelining double-buffers and prefetches across rows.
            pl.BlockSpec((None, 12 * C, THW), lambda b, d: (b, 0, d)),
            full_spec(w133f), full_spec(w311f),
            full_spec(w111af), full_spec(w111bf),
            full_spec(b133f), full_spec(b311f), full_spec(b111f),
            full_spec(bns), full_spec(bnb),
        ],
        out_specs=pl.BlockSpec((None, Cout, THW), lambda b, d: (b, 0, d)),
        compiler_params=pltpu.CompilerParams(
            dimension_semantics=("parallel", "parallel"),
            vmem_limit_bytes=32 * 1024 * 1024),
    )(xt, w133f, w311f, w111af, w111bf, b133f, b311f, b111f, bns, bnb)

    # Free reshape (same memory order) back to NCDHW.
    return out_flat.reshape(N, Cout, D, H, W)


def _reference(x, params):
    """Pure-JAX reference of the same forward pass (for verification)."""
    x = x.astype(jnp.float32)
    N, C, D, H, W = x.shape
    s = params["bn_gamma"] * jax.lax.rsqrt(params["bn_var"] + BN_EPS)
    t = params["bn_beta"] - params["bn_mean"] * s
    hi = jax.lax.Precision.HIGHEST

    def bn(a):
        return a * s[None, :, None, None, None] + t[None, :, None, None, None]

    def bias(v):
        return v[None, :, None, None, None]

    hp = jnp.pad(x, ((0, 0), (0, 0), (0, 0), (1, 1), (1, 1)), mode="edge")
    e1 = sum(jnp.einsum("ncdhw,oc->nodhw", hp[:, :, :, kh:kh + H, kw:kw + W],
                        params["w133"][:, :, kh, kw], precision=hi)
             for kh in range(3) for kw in range(3)) + bias(params["b133"])
    e1 = _leaky(bn(e1))

    dp = jnp.pad(x, ((0, 0), (0, 0), (1, 1), (0, 0), (0, 0)), mode="edge")
    e2 = sum(jnp.einsum("ncdhw,oc->nodhw", dp[:, :, kd:kd + D],
                        params["w311"][:, :, kd], precision=hi)
             for kd in range(3)) + bias(params["b311"])
    e2 = _leaky(bn(e2))

    e3 = (jnp.einsum("ncdhw,oc->nodhw", e1, params["w111a"], precision=hi)
          + jnp.einsum("ncdhw,oc->nodhw", e2, params["w111b"], precision=hi)
          + bias(params["b111"]))
    e3 = _leaky(bn(e3))

    return _leaky(bn(e3 + x))


def init_params(key, in_ch, out_ch):
    ks = jax.random.split(key, 6)
    w133 = 0.1 * jax.random.normal(ks[0], (out_ch, in_ch, 3, 3), jnp.float32)
    b133 = 0.1 * jax.random.normal(ks[1], (out_ch,), jnp.float32)
    w311 = 0.1 * jax.random.normal(ks[2], (out_ch, in_ch, 3), jnp.float32)
    b311 = 0.1 * jax.random.normal(ks[3], (out_ch,), jnp.float32)
    w111 = 0.1 * jax.random.normal(ks[4], (out_ch, 2 * out_ch), jnp.float32)
    b111 = 0.1 * jax.random.normal(ks[5], (out_ch,), jnp.float32)
    return dict(
        w133=w133, b133=b133,
        w311=w311, b311=b311,
        w111a=w111[:, :out_ch], w111b=w111[:, out_ch:], b111=b111,
        # BatchNorm3d at init (eval mode): gamma=1, beta=0, mean=0, var=1
        bn_gamma=jnp.ones((out_ch,), jnp.float32),
        bn_beta=jnp.zeros((out_ch,), jnp.float32),
        bn_mean=jnp.zeros((out_ch,), jnp.float32),
        bn_var=jnp.ones((out_ch,), jnp.float32),
    )


if __name__ == "__main__":
    key = jax.random.PRNGKey(0)
    kx, kp = jax.random.split(key)

    # Residual `e3 + input` forces in_ch == out_ch.
    in_ch = out_ch = 4
    N, D, H, W = 2, 4, 16, 16

    x = jax.random.normal(kx, (N, in_ch, D, H, W), jnp.float32)
    params = init_params(kp, in_ch, out_ch)

    y_ref = jax.block_until_ready(_reference(x, params))

    # d_tile=2 -> grid (N, 2): exercises the D tiling; default -> auto tile.
    y_tiled = jax.block_until_ready(seperate_conv3d(x, params, d_tile=2))
    y_auto = jax.block_until_ready(seperate_conv3d(x, params))

    for y in (y_tiled, y_auto):
        assert y.shape == (N, out_ch, D, H, W), y.shape
        max_err = float(jnp.max(jnp.abs(y - y_ref)))
        assert jnp.allclose(y, y_ref, atol=2e-4, rtol=2e-4), max_err
    print("KERNEL_OK")
</pallas_src>

<mosaic_0001>
module attributes {stable_mosaic.version = 11 : i64} {
  func.func @_sep_conv3d_kernel(%arg0: i32, %arg1: i32, %arg2: memref<1x48x512xf32, #tpu.memory_space<vmem>>, %arg3: memref<4x36xf32, #tpu.memory_space<vmem>>, %arg4: memref<4x12xf32, #tpu.memory_space<vmem>>, %arg5: memref<4x4xf32, #tpu.memory_space<vmem>>, %arg6: memref<4x4xf32, #tpu.memory_space<vmem>>, %arg7: memref<4x1xf32, #tpu.memory_space<vmem>>, %arg8: memref<4x1xf32, #tpu.memory_space<vmem>>, %arg9: memref<4x1xf32, #tpu.memory_space<vmem>>, %arg10: memref<4x1xf32, #tpu.memory_space<vmem>>, %arg11: memref<4x1xf32, #tpu.memory_space<vmem>>, %arg12: memref<1x4x512xf32, #tpu.memory_space<vmem>>) attributes {dimension_semantics = [#tpu.dimension_semantics<parallel>, #tpu.dimension_semantics<parallel>], iteration_bounds = array<i64: 2, 2>, scalar_prefetch = 0 : i64, scratch_operands = 0 : i64, tpu.core_type = #tpu.core_type<tc>, window_params = [{transform_indices = @transform_0, window_bounds = array<i64: 1, 48, 512>}, {pipeline_mode = #tpu.pipeline_mode<synchronous>, transform_indices = @transform_1, window_bounds = array<i64: 4, 36>}, {pipeline_mode = #tpu.pipeline_mode<synchronous>, transform_indices = @transform_2, window_bounds = array<i64: 4, 12>}, {pipeline_mode = #tpu.pipeline_mode<synchronous>, transform_indices = @transform_3, window_bounds = array<i64: 4, 4>}, {pipeline_mode = #tpu.pipeline_mode<synchronous>, transform_indices = @transform_4, window_bounds = array<i64: 4, 4>}, {pipeline_mode = #tpu.pipeline_mode<synchronous>, transform_indices = @transform_5, window_bounds = array<i64: 4, 1>}, {pipeline_mode = #tpu.pipeline_mode<synchronous>, transform_indices = @transform_6, window_bounds = array<i64: 4, 1>}, {pipeline_mode = #tpu.pipeline_mode<synchronous>, transform_indices = @transform_7, window_bounds = array<i64: 4, 1>}, {pipeline_mode = #tpu.pipeline_mode<synchronous>, transform_indices = @transform_8, window_bounds = array<i64: 4, 1>}, {pipeline_mode = #tpu.pipeline_mode<synchronous>, transform_indices = @transform_9, window_bounds = array<i64: 4, 1>}, {transform_indices = @transform_10, window_bounds = array<i64: 1, 4, 512>}]} {
    %c0 = arith.constant 0 : index
    %c0_0 = arith.constant 0 : index
    %0 = vector.load %arg3[%c0, %c0_0] : memref<4x36xf32, #tpu.memory_space<vmem>>, vector<4x36xf32>
    %c0_1 = arith.constant 0 : index
    %c0_2 = arith.constant 0 : index
    %1 = vector.load %arg4[%c0_1, %c0_2] : memref<4x12xf32, #tpu.memory_space<vmem>>, vector<4x12xf32>
    %c0_3 = arith.constant 0 : index
    %c0_4 = arith.constant 0 : index
    %2 = vector.load %arg5[%c0_3, %c0_4] : memref<4x4xf32, #tpu.memory_space<vmem>>, vector<4x4xf32>
    %c0_5 = arith.constant 0 : index
    %c0_6 = arith.constant 0 : index
    %3 = vector.load %arg6[%c0_5, %c0_6] : memref<4x4xf32, #tpu.memory_space<vmem>>, vector<4x4xf32>
    %c0_7 = arith.constant 0 : index
    %c0_8 = arith.constant 0 : index
    %4 = vector.load %arg7[%c0_7, %c0_8] : memref<4x1xf32, #tpu.memory_space<vmem>>, vector<4x1xf32>
    %c0_9 = arith.constant 0 : index
    %c0_10 = arith.constant 0 : index
    %5 = vector.load %arg8[%c0_9, %c0_10] : memref<4x1xf32, #tpu.memory_space<vmem>>, vector<4x1xf32>
    %c0_11 = arith.constant 0 : index
    %c0_12 = arith.constant 0 : index
    %6 = vector.load %arg9[%c0_11, %c0_12] : memref<4x1xf32, #tpu.memory_space<vmem>>, vector<4x1xf32>
    %c0_13 = arith.constant 0 : index
    %c0_14 = arith.constant 0 : index
    %7 = vector.load %arg10[%c0_13, %c0_14] : memref<4x1xf32, #tpu.memory_space<vmem>>, vector<4x1xf32>
    %c0_15 = arith.constant 0 : index
    %c0_16 = arith.constant 0 : index
    %8 = vector.load %arg11[%c0_15, %c0_16] : memref<4x1xf32, #tpu.memory_space<vmem>>, vector<4x1xf32>
    %cst = arith.constant 0.000000e+00 : f32
    %9 = vector.broadcast %cst : f32 to vector<4x512xf32>
    %c0_17 = arith.constant 0 : index
    %c0_18 = arith.constant 0 : index
    %c0_19 = arith.constant 0 : index
    %10 = vector.load %arg2[%c0_17, %c0_18, %c0_19] : memref<1x48x512xf32, #tpu.memory_space<vmem>>, vector<1x4x512xf32>
    %11 = vector.shape_cast %10 : vector<1x4x512xf32> to vector<4x512xf32>
    %12 = vector.extract_strided_slice %0 {offsets = [0, 0], sizes = [4, 1], strides = [1, 1]} : vector<4x36xf32> to vector<4x1xf32>
    %13 = vector.extract_strided_slice %11 {offsets = [0, 0], sizes = [1, 512], strides = [1, 1]} : vector<4x512xf32> to vector<1x512xf32>
    %14 = vector.broadcast %12 : vector<4x1xf32> to vector<4x512xf32>
    %15 = vector.broadcast %13 : vector<1x512xf32> to vector<4x512xf32>
    %16 = arith.mulf %14, %15 : vector<4x512xf32>
    %17 = arith.addf %9, %16 : vector<4x512xf32>
    %18 = vector.extract_strided_slice %0 {offsets = [0, 1], sizes = [4, 1], strides = [1, 1]} : vector<4x36xf32> to vector<4x1xf32>
    %19 = vector.extract_strided_slice %11 {offsets = [1, 0], sizes = [1, 512], strides = [1, 1]} : vector<4x512xf32> to vector<1x512xf32>
    %20 = vector.broadcast %18 : vector<4x1xf32> to vector<4x512xf32>
    %21 = vector.broadcast %19 : vector<1x512xf32> to vector<4x512xf32>
    %22 = arith.mulf %20, %21 : vector<4x512xf32>
    %23 = arith.addf %17, %22 : vector<4x512xf32>
    %24 = vector.extract_strided_slice %0 {offsets = [0, 2], sizes = [4, 1], strides = [1, 1]} : vector<4x36xf32> to vector<4x1xf32>
    %25 = vector.extract_strided_slice %11 {offsets = [2, 0], sizes = [1, 512], strides = [1, 1]} : vector<4x512xf32> to vector<1x512xf32>
    %26 = vector.broadcast %24 : vector<4x1xf32> to vector<4x512xf32>
    %27 = vector.broadcast %25 : vector<1x512xf32> to vector<4x512xf32>
    %28 = arith.mulf %26, %27 : vector<4x512xf32>
    %29 = arith.addf %23, %28 : vector<4x512xf32>
    %30 = vector.extract_strided_slice %0 {offsets = [0, 3], sizes = [4, 1], strides = [1, 1]} : vector<4x36xf32> to vector<4x1xf32>
    %31 = vector.extract_strided_slice %11 {offsets = [3, 0], sizes = [1, 512], strides = [1, 1]} : vector<4x512xf32> to vector<1x512xf32>
    %32 = vector.broadcast %30 : vector<4x1xf32> to vector<4x512xf32>
    %33 = vector.broadcast %31 : vector<1x512xf32> to vector<4x512xf32>
    %34 = arith.mulf %32, %33 : vector<4x512xf32>
    %35 = arith.addf %29, %34 : vector<4x512xf32>
    %c0_20 = arith.constant 0 : index
    %c4 = arith.constant 4 : index
    %c0_21 = arith.constant 0 : index
    %36 = vector.load %arg2[%c0_20, %c4, %c0_21] : memref<1x48x512xf32, #tpu.memory_space<vmem>>, vector<1x4x512xf32>
    %37 = vector.shape_cast %36 : vector<1x4x512xf32> to vector<4x512xf32>
    %38 = vector.extract_strided_slice %0 {offsets = [0, 4], sizes = [4, 1], strides = [1, 1]} : vector<4x36xf32> to vector<4x1xf32>
    %39 = vector.extract_strided_slice %37 {offsets = [0, 0], sizes = [1, 512], strides = [1, 1]} : vector<4x512xf32> to vector<1x512xf32>
    %40 = vector.broadcast %38 : vector<4x1xf32> to vector<4x512xf32>
    %41 = vector.broadcast %39 : vector<1x512xf32> to vector<4x512xf32>
    %42 = arith.mulf %40, %41 : vector<4x512xf32>
    %43 = arith.addf %35, %42 : vector<4x512xf32>
    %44 = vector.extract_strided_slice %0 {offsets = [0, 5], sizes = [4, 1], strides = [1, 1]} : vector<4x36xf32> to vector<4x1xf32>
    %45 = vector.extract_strided_slice %37 {offsets = [1, 0], sizes = [1, 512], strides = [1, 1]} : vector<4x512xf32> to vector<1x512xf32>
    %46 = vector.broadcast %44 : vector<4x1xf32> to vector<4x512xf32>
    %47 = vector.broadcast %45 : vector<1x512xf32> to vector<4x512xf32>
    %48 = arith.mulf %46, %47 : vector<4x512xf32>
    %49 = arith.addf %43, %48 : vector<4x512xf32>
    %50 = vector.extract_strided_slice %0 {offsets = [0, 6], sizes = [4, 1], strides = [1, 1]} : vector<4x36xf32> to vector<4x1xf32>
    %51 = vector.extract_strided_slice %37 {offsets = [2, 0], sizes = [1, 512], strides = [1, 1]} : vector<4x512xf32> to vector<1x512xf32>
    %52 = vector.broadcast %50 : vector<4x1xf32> to vector<4x512xf32>
    %53 = vector.broadcast %51 : vector<1x512xf32> to vector<4x512xf32>
    %54 = arith.mulf %52, %53 : vector<4x512xf32>
    %55 = arith.addf %49, %54 : vector<4x512xf32>
    %56 = vector.extract_strided_slice %0 {offsets = [0, 7], sizes = [4, 1], strides = [1, 1]} : vector<4x36xf32> to vector<4x1xf32>
    %57 = vector.extract_strided_slice %37 {offsets = [3, 0], sizes = [1, 512], strides = [1, 1]} : vector<4x512xf32> to vector<1x512xf32>
    %58 = vector.broadcast %56 : vector<4x1xf32> to vector<4x512xf32>
    %59 = vector.broadcast %57 : vector<1x512xf32> to vector<4x512xf32>
    %60 = arith.mulf %58, %59 : vector<4x512xf32>
    %61 = arith.addf %55, %60 : vector<4x512xf32>
    %c0_22 = arith.constant 0 : index
    %c8 = arith.constant 8 : index
    %c0_23 = arith.constant 0 : index
    %62 = vector.load %arg2[%c0_22, %c8, %c0_23] : memref<1x48x512xf32, #tpu.memory_space<vmem>>, vector<1x4x512xf32>
    %63 = vector.shape_cast %62 : vector<1x4x512xf32> to vector<4x512xf32>
    %64 = vector.extract_strided_slice %0 {offsets = [0, 8], sizes = [4, 1], strides = [1, 1]} : vector<4x36xf32> to vector<4x1xf32>
    %65 = vector.extract_strided_slice %63 {offsets = [0, 0], sizes = [1, 512], strides = [1, 1]} : vector<4x512xf32> to vector<1x512xf32>
    %66 = vector.broadcast %64 : vector<4x1xf32> to vector<4x512xf32>
    %67 = vector.broadcast %65 : vector<1x512xf32> to vector<4x512xf32>
    %68 = arith.mulf %66, %67 : vector<4x512xf32>
    %69 = arith.addf %61, %68 : vector<4x512xf32>
    %70 = vector.extract_strided_slice %0 {offsets = [0, 9], sizes = [4, 1], strides = [1, 1]} : vector<4x36xf32> to vector<4x1xf32>
    %71 = vector.extract_strided_slice %63 {offsets = [1, 0], sizes = [1, 512], strides = [1, 1]} : vector<4x512xf32> to vector<1x512xf32>
    %72 = vector.broadcast %70 : vector<4x1xf32> to vector<4x512xf32>
    %73 = vector.broadcast %71 : vector<1x512xf32> to vector<4x512xf32>
    %74 = arith.mulf %72, %73 : vector<4x512xf32>
    %75 = arith.addf %69, %74 : vector<4x512xf32>
    %76 = vector.extract_strided_slice %0 {offsets = [0, 10], sizes = [4, 1], strides = [1, 1]} : vector<4x36xf32> to vector<4x1xf32>
    %77 = vector.extract_strided_slice %63 {offsets = [2, 0], sizes = [1, 512], strides = [1, 1]} : vector<4x512xf32> to vector<1x512xf32>
    %78 = vector.broadcast %76 : vector<4x1xf32> to vector<4x512xf32>
    %79 = vector.broadcast %77 : vector<1x512xf32> to vector<4x512xf32>
    %80 = arith.mulf %78, %79 : vector<4x512xf32>
    %81 = arith.addf %75, %80 : vector<4x512xf32>
    %82 = vector.extract_strided_slice %0 {offsets = [0, 11], sizes = [4, 1], strides = [1, 1]} : vector<4x36xf32> to vector<4x1xf32>
    %83 = vector.extract_strided_slice %63 {offsets = [3, 0], sizes = [1, 512], strides = [1, 1]} : vector<4x512xf32> to vector<1x512xf32>
    %84 = vector.broadcast %82 : vector<4x1xf32> to vector<4x512xf32>
    %85 = vector.broadcast %83 : vector<1x512xf32> to vector<4x512xf32>
    %86 = arith.mulf %84, %85 : vector<4x512xf32>
    %87 = arith.addf %81, %86 : vector<4x512xf32>
    %c0_24 = arith.constant 0 : index
    %c12 = arith.constant 12 : index
    %c0_25 = arith.constant 0 : index
    %88 = vector.load %arg2[%c0_24, %c12, %c0_25] : memref<1x48x512xf32, #tpu.memory_space<vmem>>, vector<1x4x512xf32>
    %89 = vector.shape_cast %88 : vector<1x4x512xf32> to vector<4x512xf32>
    %90 = vector.extract_strided_slice %0 {offsets = [0, 12], sizes = [4, 1], strides = [1, 1]} : vector<4x36xf32> to vector<4x1xf32>
    %91 = vector.extract_strided_slice %89 {offsets = [0, 0], sizes = [1, 512], strides = [1, 1]} : vector<4x512xf32> to vector<1x512xf32>
    %92 = vector.broadcast %90 : vector<4x1xf32> to vector<4x512xf32>
    %93 = vector.broadcast %91 : vector<1x512xf32> to vector<4x512xf32>
    %94 = arith.mulf %92, %93 : vector<4x512xf32>
    %95 = arith.addf %87, %94 : vector<4x512xf32>
    %96 = vector.extract_strided_slice %0 {offsets = [0, 13], sizes = [4, 1], strides = [1, 1]} : vector<4x36xf32> to vector<4x1xf32>
    %97 = vector.extract_strided_slice %89 {offsets = [1, 0], sizes = [1, 512], strides = [1, 1]} : vector<4x512xf32> to vector<1x512xf32>
    %98 = vector.broadcast %96 : vector<4x1xf32> to vector<4x512xf32>
    %99 = vector.broadcast %97 : vector<1x512xf32> to vector<4x512xf32>
    %100 = arith.mulf %98, %99 : vector<4x512xf32>
    %101 = arith.addf %95, %100 : vector<4x512xf32>
    %102 = vector.extract_strided_slice %0 {offsets = [0, 14], sizes = [4, 1], strides = [1, 1]} : vector<4x36xf32> to vector<4x1xf32>
    %103 = vector.extract_strided_slice %89 {offsets = [2, 0], sizes = [1, 512], strides = [1, 1]} : vector<4x512xf32> to vector<1x512xf32>
    %104 = vector.broadcast %102 : vector<4x1xf32> to vector<4x512xf32>
    %105 = vector.broadcast %103 : vector<1x512xf32> to vector<4x512xf32>
    %106 = arith.mulf %104, %105 : vector<4x512xf32>
    %107 = arith.addf %101, %106 : vector<4x512xf32>
    %108 = vector.extract_strided_slice %0 {offsets = [0, 15], sizes = [4, 1], strides = [1, 1]} : vector<4x36xf32> to vector<4x1xf32>
    %109 = vector.extract_strided_slice %89 {offsets = [3, 0], sizes = [1, 512], strides = [1, 1]} : vector<4x512xf32> to vector<1x512xf32>
    %110 = vector.broadcast %108 : vector<4x1xf32> to vector<4x512xf32>
    %111 = vector.broadcast %109 : vector<1x512xf32> to vector<4x512xf32>
    %112 = arith.mulf %110, %111 : vector<4x512xf32>
    %113 = arith.addf %107, %112 : vector<4x512xf32>
    %c0_26 = arith.constant 0 : index
    %c16 = arith.constant 16 : index
    %c0_27 = arith.constant 0 : index
    %114 = vector.load %arg2[%c0_26, %c16, %c0_27] : memref<1x48x512xf32, #tpu.memory_space<vmem>>, vector<1x4x512xf32>
    %115 = vector.shape_cast %114 : vector<1x4x512xf32> to vector<4x512xf32>
    %116 = vector.extract_strided_slice %0 {offsets = [0, 16], sizes = [4, 1], strides = [1, 1]} : vector<4x36xf32> to vector<4x1xf32>
    %117 = vector.extract_strided_slice %115 {offsets = [0, 0], sizes = [1, 512], strides = [1, 1]} : vector<4x512xf32> to vector<1x512xf32>
    %118 = vector.broadcast %116 : vector<4x1xf32> to vector<4x512xf32>
    %119 = vector.broadcast %117 : vector<1x512xf32> to vector<4x512xf32>
    %120 = arith.mulf %118, %119 : vector<4x512xf32>
    %121 = arith.addf %113, %120 : vector<4x512xf32>
    %122 = vector.extract_strided_slice %0 {offsets = [0, 17], sizes = [4, 1], strides = [1, 1]} : vector<4x36xf32> to vector<4x1xf32>
    %123 = vector.extract_strided_slice %115 {offsets = [1, 0], sizes = [1, 512], strides = [1, 1]} : vector<4x512xf32> to vector<1x512xf32>
    %124 = vector.broadcast %122 : vector<4x1xf32> to vector<4x512xf32>
    %125 = vector.broadcast %123 : vector<1x512xf32> to vector<4x512xf32>
    %126 = arith.mulf %124, %125 : vector<4x512xf32>
    %127 = arith.addf %121, %126 : vector<4x512xf32>
    %128 = vector.extract_strided_slice %0 {offsets = [0, 18], sizes = [4, 1], strides = [1, 1]} : vector<4x36xf32> to vector<4x1xf32>
    %129 = vector.extract_strided_slice %115 {offsets = [2, 0], sizes = [1, 512], strides = [1, 1]} : vector<4x512xf32> to vector<1x512xf32>
    %130 = vector.broadcast %128 : vector<4x1xf32> to vector<4x512xf32>
    %131 = vector.broadcast %129 : vector<1x512xf32> to vector<4x512xf32>
    %132 = arith.mulf %130, %131 : vector<4x512xf32>
    %133 = arith.addf %127, %132 : vector<4x512xf32>
    %134 = vector.extract_strided_slice %0 {offsets = [0, 19], sizes = [4, 1], strides = [1, 1]} : vector<4x36xf32> to vector<4x1xf32>
    %135 = vector.extract_strided_slice %115 {offsets = [3, 0], sizes = [1, 512], strides = [1, 1]} : vector<4x512xf32> to vector<1x512xf32>
    %136 = vector.broadcast %134 : vector<4x1xf32> to vector<4x512xf32>
    %137 = vector.broadcast %135 : vector<1x512xf32> to vector<4x512xf32>
    %138 = arith.mulf %136, %137 : vector<4x512xf32>
    %139 = arith.addf %133, %138 : vector<4x512xf32>
    %c0_28 = arith.constant 0 : index
    %c20 = arith.constant 20 : index
    %c0_29 = arith.constant 0 : index
    %140 = vector.load %arg2[%c0_28, %c20, %c0_29] : memref<1x48x512xf32, #tpu.memory_space<vmem>>, vector<1x4x512xf32>
    %141 = vector.shape_cast %140 : vector<1x4x512xf32> to vector<4x512xf32>
    %142 = vector.extract_strided_slice %0 {offsets = [0, 20], sizes = [4, 1], strides = [1, 1]} : vector<4x36xf32> to vector<4x1xf32>
    %143 = vector.extract_strided_slice %141 {offsets = [0, 0], sizes = [1, 512], strides = [1, 1]} : vector<4x512xf32> to vector<1x512xf32>
    %144 = vector.broadcast %142 : vector<4x1xf32> to vector<4x512xf32>
    %145 = vector.broadcast %143 : vector<1x512xf32> to vector<4x512xf32>
    %146 = arith.mulf %144, %145 : vector<4x512xf32>
    %147 = arith.addf %139, %146 : vector<4x512xf32>
    %148 = vector.extract_strided_slice %0 {offsets = [0, 21], sizes = [4, 1], strides = [1, 1]} : vector<4x36xf32> to vector<4x1xf32>
    %149 = vector.extract_strided_slice %141 {offsets = [1, 0], sizes = [1, 512], strides = [1, 1]} : vector<4x512xf32> to vector<1x512xf32>
    %150 = vector.broadcast %148 : vector<4x1xf32> to vector<4x512xf32>
    %151 = vector.broadcast %149 : vector<1x512xf32> to vector<4x512xf32>
    %152 = arith.mulf %150, %151 : vector<4x512xf32>
    %153 = arith.addf %147, %152 : vector<4x512xf32>
    %154 = vector.extract_strided_slice %0 {offsets = [0, 22], sizes = [4, 1], strides = [1, 1]} : vector<4x36xf32> to vector<4x1xf32>
    %155 = vector.extract_strided_slice %141 {offsets = [2, 0], sizes = [1, 512], strides = [1, 1]} : vector<4x512xf32> to vector<1x512xf32>
    %156 = vector.broadcast %154 : vector<4x1xf32> to vector<4x512xf32>
    %157 = vector.broadcast %155 : vector<1x512xf32> to vector<4x512xf32>
    %158 = arith.mulf %156, %157 : vector<4x512xf32>
    %159 = arith.addf %153, %158 : vector<4x512xf32>
    %160 = vector.extract_strided_slice %0 {offsets = [0, 23], sizes = [4, 1], strides = [1, 1]} : vector<4x36xf32> to vector<4x1xf32>
    %161 = vector.extract_strided_slice %141 {offsets = [3, 0], sizes = [1, 512], strides = [1, 1]} : vector<4x512xf32> to vector<1x512xf32>
    %162 = vector.broadcast %160 : vector<4x1xf32> to vector<4x512xf32>
    %163 = vector.broadcast %161 : vector<1x512xf32> to vector<4x512xf32>
    %164 = arith.mulf %162, %163 : vector<4x512xf32>
    %165 = arith.addf %159, %164 : vector<4x512xf32>
    %c0_30 = arith.constant 0 : index
    %c24 = arith.constant 24 : index
    %c0_31 = arith.constant 0 : index
    %166 = vector.load %arg2[%c0_30, %c24, %c0_31] : memref<1x48x512xf32, #tpu.memory_space<vmem>>, vector<1x4x512xf32>
    %167 = vector.shape_cast %166 : vector<1x4x512xf32> to vector<4x512xf32>
    %168 = vector.extract_strided_slice %0 {offsets = [0, 24], sizes = [4, 1], strides = [1, 1]} : vector<4x36xf32> to vector<4x1xf32>
    %169 = vector.extract_strided_slice %167 {offsets = [0, 0], sizes = [1, 512], strides = [1, 1]} : vector<4x512xf32> to vector<1x512xf32>
    %170 = vector.broadcast %168 : vector<4x1xf32> to vector<4x512xf32>
    %171 = vector.broadcast %169 : vector<1x512xf32> to vector<4x512xf32>
    %172 = arith.mulf %170, %171 : vector<4x512xf32>
    %173 = arith.addf %165, %172 : vector<4x512xf32>
    %174 = vector.extract_strided_slice %0 {offsets = [0, 25], sizes = [4, 1], strides = [1, 1]} : vector<4x36xf32> to vector<4x1xf32>
    %175 = vector.extract_strided_slice %167 {offsets = [1, 0], sizes = [1, 512], strides = [1, 1]} : vector<4x512xf32> to vector<1x512xf32>
    %176 = vector.broadcast %174 : vector<4x1xf32> to vector<4x512xf32>
    %177 = vector.broadcast %175 : vector<1x512xf32> to vector<4x512xf32>
    %178 = arith.mulf %176, %177 : vector<4x512xf32>
    %179 = arith.addf %173, %178 : vector<4x512xf32>
    %180 = vector.extract_strided_slice %0 {offsets = [0, 26], sizes = [4, 1], strides = [1, 1]} : vector<4x36xf32> to vector<4x1xf32>
    %181 = vector.extract_strided_slice %167 {offsets = [2, 0], sizes = [1, 512], strides = [1, 1]} : vector<4x512xf32> to vector<1x512xf32>
    %182 = vector.broadcast %180 : vector<4x1xf32> to vector<4x512xf32>
    %183 = vector.broadcast %181 : vector<1x512xf32> to vector<4x512xf32>
    %184 = arith.mulf %182, %183 : vector<4x512xf32>
    %185 = arith.addf %179, %184 : vector<4x512xf32>
    %186 = vector.extract_strided_slice %0 {offsets = [0, 27], sizes = [4, 1], strides = [1, 1]} : vector<4x36xf32> to vector<4x1xf32>
    %187 = vector.extract_strided_slice %167 {offsets = [3, 0], sizes = [1, 512], strides = [1, 1]} : vector<4x512xf32> to vector<1x512xf32>
    %188 = vector.broadcast %186 : vector<4x1xf32> to vector<4x512xf32>
    %189 = vector.broadcast %187 : vector<1x512xf32> to vector<4x512xf32>
    %190 = arith.mulf %188, %189 : vector<4x512xf32>
    %191 = arith.addf %185, %190 : vector<4x512xf32>
    %c0_32 = arith.constant 0 : index
    %c28 = arith.constant 28 : index
    %c0_33 = arith.constant 0 : index
    %192 = vector.load %arg2[%c0_32, %c28, %c0_33] : memref<1x48x512xf32, #tpu.memory_space<vmem>>, vector<1x4x512xf32>
    %193 = vector.shape_cast %192 : vector<1x4x512xf32> to vector<4x512xf32>
    %194 = vector.extract_strided_slice %0 {offsets = [0, 28], sizes = [4, 1], strides = [1, 1]} : vector<4x36xf32> to vector<4x1xf32>
    %195 = vector.extract_strided_slice %193 {offsets = [0, 0], sizes = [1, 512], strides = [1, 1]} : vector<4x512xf32> to vector<1x512xf32>
    %196 = vector.broadcast %194 : vector<4x1xf32> to vector<4x512xf32>
    %197 = vector.broadcast %195 : vector<1x512xf32> to vector<4x512xf32>
    %198 = arith.mulf %196, %197 : vector<4x512xf32>
    %199 = arith.addf %191, %198 : vector<4x512xf32>
    %200 = vector.extract_strided_slice %0 {offsets = [0, 29], sizes = [4, 1], strides = [1, 1]} : vector<4x36xf32> to vector<4x1xf32>
    %201 = vector.extract_strided_slice %193 {offsets = [1, 0], sizes = [1, 512], strides = [1, 1]} : vector<4x512xf32> to vector<1x512xf32>
    %202 = vector.broadcast %200 : vector<4x1xf32> to vector<4x512xf32>
    %203 = vector.broadcast %201 : vector<1x512xf32> to vector<4x512xf32>
    %204 = arith.mulf %202, %203 : vector<4x512xf32>
    %205 = arith.addf %199, %204 : vector<4x512xf32>
    %206 = vector.extract_strided_slice %0 {offsets = [0, 30], sizes = [4, 1], strides = [1, 1]} : vector<4x36xf32> to vector<4x1xf32>
    %207 = vector.extract_strided_slice %193 {offsets = [2, 0], sizes = [1, 512], strides = [1, 1]} : vector<4x512xf32> to vector<1x512xf32>
    %208 = vector.broadcast %206 : vector<4x1xf32> to vector<4x512xf32>
    %209 = vector.broadcast %207 : vector<1x512xf32> to vector<4x512xf32>
    %210 = arith.mulf %208, %209 : vector<4x512xf32>
    %211 = arith.addf %205, %210 : vector<4x512xf32>
    %212 = vector.extract_strided_slice %0 {offsets = [0, 31], sizes = [4, 1], strides = [1, 1]} : vector<4x36xf32> to vector<4x1xf32>
    %213 = vector.extract_strided_slice %193 {offsets = [3, 0], sizes = [1, 512], strides = [1, 1]} : vector<4x512xf32> to vector<1x512xf32>
    %214 = vector.broadcast %212 : vector<4x1xf32> to vector<4x512xf32>
    %215 = vector.broadcast %213 : vector<1x512xf32> to vector<4x512xf32>
    %216 = arith.mulf %214, %215 : vector<4x512xf32>
    %217 = arith.addf %211, %216 : vector<4x512xf32>
    %c0_34 = arith.constant 0 : index
    %c32 = arith.constant 32 : index
    %c0_35 = arith.constant 0 : index
    %218 = vector.load %arg2[%c0_34, %c32, %c0_35] : memref<1x48x512xf32, #tpu.memory_space<vmem>>, vector<1x4x512xf32>
    %219 = vector.shape_cast %218 : vector<1x4x512xf32> to vector<4x512xf32>
    %220 = vector.extract_strided_slice %0 {offsets = [0, 32], sizes = [4, 1], strides = [1, 1]} : vector<4x36xf32> to vector<4x1xf32>
    %221 = vector.extract_strided_slice %219 {offsets = [0, 0], sizes = [1, 512], strides = [1, 1]} : vector<4x512xf32> to vector<1x512xf32>
    %222 = vector.broadcast %220 : vector<4x1xf32> to vector<4x512xf32>
    %223 = vector.broadcast %221 : vector<1x512xf32> to vector<4x512xf32>
    %224 = arith.mulf %222, %223 : vector<4x512xf32>
    %225 = arith.addf %217, %224 : vector<4x512xf32>
    %226 = vector.extract_strided_slice %0 {offsets = [0, 33], sizes = [4, 1], strides = [1, 1]} : vector<4x36xf32> to vector<4x1xf32>
    %227 = vector.extract_strided_slice %219 {offsets = [1, 0], sizes = [1, 512], strides = [1, 1]} : vector<4x512xf32> to vector<1x512xf32>
    %228 = vector.broadcast %226 : vector<4x1xf32> to vector<4x512xf32>
    %229 = vector.broadcast %227 : vector<1x512xf32> to vector<4x512xf32>
    %230 = arith.mulf %228, %229 : vector<4x512xf32>
    %231 = arith.addf %225, %230 : vector<4x512xf32>
    %232 = vector.extract_strided_slice %0 {offsets = [0, 34], sizes = [4, 1], strides = [1, 1]} : vector<4x36xf32> to vector<4x1xf32>
    %233 = vector.extract_strided_slice %219 {offsets = [2, 0], sizes = [1, 512], strides = [1, 1]} : vector<4x512xf32> to vector<1x512xf32>
    %234 = vector.broadcast %232 : vector<4x1xf32> to vector<4x512xf32>
    %235 = vector.broadcast %233 : vector<1x512xf32> to vector<4x512xf32>
    %236 = arith.mulf %234, %235 : vector<4x512xf32>
    %237 = arith.addf %231, %236 : vector<4x512xf32>
    %238 = vector.extract_strided_slice %0 {offsets = [0, 35], sizes = [4, 1], strides = [1, 1]} : vector<4x36xf32> to vector<4x1xf32>
    %239 = vector.extract_strided_slice %219 {offsets = [3, 0], sizes = [1, 512], strides = [1, 1]} : vector<4x512xf32> to vector<1x512xf32>
    %240 = vector.broadcast %238 : vector<4x1xf32> to vector<4x512xf32>
    %241 = vector.broadcast %239 : vector<1x512xf32> to vector<4x512xf32>
    %242 = arith.mulf %240, %241 : vector<4x512xf32>
    %243 = arith.addf %237, %242 : vector<4x512xf32>
    %244 = vector.broadcast %4 : vector<4x1xf32> to vector<4x512xf32>
    %245 = arith.addf %243, %244 : vector<4x512xf32>
    %cst_36 = arith.constant 0.00999999977 : f32
    %246 = vector.broadcast %cst_36 : f32 to vector<4x512xf32>
    %247 = arith.mulf %246, %245 : vector<4x512xf32>
    %248 = arith.maximumf %245, %247 : vector<4x512xf32>
    %cst_37 = arith.constant 0.000000e+00 : f32
    %249 = vector.broadcast %cst_37 : f32 to vector<4x512xf32>
    %250 = vector.extract_strided_slice %2 {offsets = [0, 0], sizes = [4, 1], strides = [1, 1]} : vector<4x4xf32> to vector<4x1xf32>
    %251 = vector.extract_strided_slice %248 {offsets = [0, 0], sizes = [1, 512], strides = [1, 1]} : vector<4x512xf32> to vector<1x512xf32>
    %252 = vector.broadcast %250 : vector<4x1xf32> to vector<4x512xf32>
    %253 = vector.broadcast %251 : vector<1x512xf32> to vector<4x512xf32>
    %254 = arith.mulf %252, %253 : vector<4x512xf32>
    %255 = arith.addf %249, %254 : vector<4x512xf32>
    %256 = vector.extract_strided_slice %2 {offsets = [0, 1], sizes = [4, 1], strides = [1, 1]} : vector<4x4xf32> to vector<4x1xf32>
    %257 = vector.extract_strided_slice %248 {offsets = [1, 0], sizes = [1, 512], strides = [1, 1]} : vector<4x512xf32> to vector<1x512xf32>
    %258 = vector.broadcast %256 : vector<4x1xf32> to vector<4x512xf32>
    %259 = vector.broadcast %257 : vector<1x512xf32> to vector<4x512xf32>
    %260 = arith.mulf %258, %259 : vector<4x512xf32>
    %261 = arith.addf %255, %260 : vector<4x512xf32>
    %262 = vector.extract_strided_slice %2 {offsets = [0, 2], sizes = [4, 1], strides = [1, 1]} : vector<4x4xf32> to vector<4x1xf32>
    %263 = vector.extract_strided_slice %248 {offsets = [2, 0], sizes = [1, 512], strides = [1, 1]} : vector<4x512xf32> to vector<1x512xf32>
    %264 = vector.broadcast %262 : vector<4x1xf32> to vector<4x512xf32>
    %265 = vector.broadcast %263 : vector<1x512xf32> to vector<4x512xf32>
    %266 = arith.mulf %264, %265 : vector<4x512xf32>
    %267 = arith.addf %261, %266 : vector<4x512xf32>
    %268 = vector.extract_strided_slice %2 {offsets = [0, 3], sizes = [4, 1], strides = [1, 1]} : vector<4x4xf32> to vector<4x1xf32>
    %269 = vector.extract_strided_slice %248 {offsets = [3, 0], sizes = [1, 512], strides = [1, 1]} : vector<4x512xf32> to vector<1x512xf32>
    %270 = vector.broadcast %268 : vector<4x1xf32> to vector<4x512xf32>
    %271 = vector.broadcast %269 : vector<1x512xf32> to vector<4x512xf32>
    %272 = arith.mulf %270, %271 : vector<4x512xf32>
    %273 = arith.addf %267, %272 : vector<4x512xf32>
    %c0_38 = arith.constant 0 : index
    %c36 = arith.constant 36 : index
    %c0_39 = arith.constant 0 : index
    %274 = vector.load %arg2[%c0_38, %c36, %c0_39] : memref<1x48x512xf32, #tpu.memory_space<vmem>>, vector<1x4x512xf32>
    %275 = vector.shape_cast %274 : vector<1x4x512xf32> to vector<4x512xf32>
    %c0_40 = arith.constant 0 : index
    %c40 = arith.constant 40 : index
    %c0_41 = arith.constant 0 : index
    %276 = vector.load %arg2[%c0_40, %c40, %c0_41] : memref<1x48x512xf32, #tpu.memory_space<vmem>>, vector<1x4x512xf32>
    %277 = vector.shape_cast %276 : vector<1x4x512xf32> to vector<4x512xf32>
    %c0_42 = arith.constant 0 : index
    %c44 = arith.constant 44 : index
    %c0_43 = arith.constant 0 : index
    %278 = vector.load %arg2[%c0_42, %c44, %c0_43] : memref<1x48x512xf32, #tpu.memory_space<vmem>>, vector<1x4x512xf32>
    %279 = vector.shape_cast %278 : vector<1x4x512xf32> to vector<4x512xf32>
    %cst_44 = arith.constant 0.000000e+00 : f32
    %280 = vector.broadcast %cst_44 : f32 to vector<4x512xf32>
    %281 = vector.extract_strided_slice %1 {offsets = [0, 0], sizes = [4, 1], strides = [1, 1]} : vector<4x12xf32> to vector<4x1xf32>
    %282 = vector.extract_strided_slice %275 {offsets = [0, 0], sizes = [1, 512], strides = [1, 1]} : vector<4x512xf32> to vector<1x512xf32>
    %283 = vector.broadcast %281 : vector<4x1xf32> to vector<4x512xf32>
    %284 = vector.broadcast %282 : vector<1x512xf32> to vector<4x512xf32>
    %285 = arith.mulf %283, %284 : vector<4x512xf32>
    %286 = arith.addf %280, %285 : vector<4x512xf32>
    %287 = vector.extract_strided_slice %1 {offsets = [0, 1], sizes = [4, 1], strides = [1, 1]} : vector<4x12xf32> to vector<4x1xf32>
    %288 = vector.extract_strided_slice %275 {offsets = [1, 0], sizes = [1, 512], strides = [1, 1]} : vector<4x512xf32> to vector<1x512xf32>
    %289 = vector.broadcast %287 : vector<4x1xf32> to vector<4x512xf32>
    %290 = vector.broadcast %288 : vector<1x512xf32> to vector<4x512xf32>
    %291 = arith.mulf %289, %290 : vector<4x512xf32>
    %292 = arith.addf %286, %291 : vector<4x512xf32>
    %293 = vector.extract_strided_slice %1 {offsets = [0, 2], sizes = [4, 1], strides = [1, 1]} : vector<4x12xf32> to vector<4x1xf32>
    %294 = vector.extract_strided_slice %275 {offsets = [2, 0], sizes = [1, 512], strides = [1, 1]} : vector<4x512xf32> to vector<1x512xf32>
    %295 = vector.broadcast %293 : vector<4x1xf32> to vector<4x512xf32>
    %296 = vector.broadcast %294 : vector<1x512xf32> to vector<4x512xf32>
    %297 = arith.mulf %295, %296 : vector<4x512xf32>
    %298 = arith.addf %292, %297 : vector<4x512xf32>
    %299 = vector.extract_strided_slice %1 {offsets = [0, 3], sizes = [4, 1], strides = [1, 1]} : vector<4x12xf32> to vector<4x1xf32>
    %300 = vector.extract_strided_slice %275 {offsets = [3, 0], sizes = [1, 512], strides = [1, 1]} : vector<4x512xf32> to vector<1x512xf32>
    %301 = vector.broadcast %299 : vector<4x1xf32> to vector<4x512xf32>
    %302 = vector.broadcast %300 : vector<1x512xf32> to vector<4x512xf32>
    %303 = arith.mulf %301, %302 : vector<4x512xf32>
    %304 = arith.addf %298, %303 : vector<4x512xf32>
    %305 = vector.extract_strided_slice %1 {offsets = [0, 4], sizes = [4, 1], strides = [1, 1]} : vector<4x12xf32> to vector<4x1xf32>
    %306 = vector.extract_strided_slice %279 {offsets = [0, 0], sizes = [1, 512], strides = [1, 1]} : vector<4x512xf32> to vector<1x512xf32>
    %307 = vector.broadcast %305 : vector<4x1xf32> to vector<4x512xf32>
    %308 = vector.broadcast %306 : vector<1x512xf32> to vector<4x512xf32>
    %309 = arith.mulf %307, %308 : vector<4x512xf32>
    %310 = arith.addf %304, %309 : vector<4x512xf32>
    %311 = vector.extract_strided_slice %1 {offsets = [0, 5], sizes = [4, 1], strides = [1, 1]} : vector<4x12xf32> to vector<4x1xf32>
    %312 = vector.extract_strided_slice %279 {offsets = [1, 0], sizes = [1, 512], strides = [1, 1]} : vector<4x512xf32> to vector<1x512xf32>
    %313 = vector.broadcast %311 : vector<4x1xf32> to vector<4x512xf32>
    %314 = vector.broadcast %312 : vector<1x512xf32> to vector<4x512xf32>
    %315 = arith.mulf %313, %314 : vector<4x512xf32>
    %316 = arith.addf %310, %315 : vector<4x512xf32>
    %317 = vector.extract_strided_slice %1 {offsets = [0, 6], sizes = [4, 1], strides = [1, 1]} : vector<4x12xf32> to vector<4x1xf32>
    %318 = vector.extract_strided_slice %279 {offsets = [2, 0], sizes = [1, 512], strides = [1, 1]} : vector<4x512xf32> to vector<1x512xf32>
    %319 = vector.broadcast %317 : vector<4x1xf32> to vector<4x512xf32>
    %320 = vector.broadcast %318 : vector<1x512xf32> to vector<4x512xf32>
    %321 = arith.mulf %319, %320 : vector<4x512xf32>
    %322 = arith.addf %316, %321 : vector<4x512xf32>
    %323 = vector.extract_strided_slice %1 {offsets = [0, 7], sizes = [4, 1], strides = [1, 1]} : vector<4x12xf32> to vector<4x1xf32>
    %324 = vector.extract_strided_slice %279 {offsets = [3, 0], sizes = [1, 512], strides = [1, 1]} : vector<4x512xf32> to vector<1x512xf32>
    %325 = vector.broadcast %323 : vector<4x1xf32> to vector<4x512xf32>
    %326 = vector.broadcast %324 : vector<1x512xf32> to vector<4x512xf32>
    %327 = arith.mulf %325, %326 : vector<4x512xf32>
    %328 = arith.addf %322, %327 : vector<4x512xf32>
    %329 = vector.extract_strided_slice %1 {offsets = [0, 8], sizes = [4, 1], strides = [1, 1]} : vector<4x12xf32> to vector<4x1xf32>
    %330 = vector.extract_strided_slice %277 {offsets = [0, 0], sizes = [1, 512], strides = [1, 1]} : vector<4x512xf32> to vector<1x512xf32>
    %331 = vector.broadcast %329 : vector<4x1xf32> to vector<4x512xf32>
    %332 = vector.broadcast %330 : vector<1x512xf32> to vector<4x512xf32>
    %333 = arith.mulf %331, %332 : vector<4x512xf32>
    %334 = arith.addf %328, %333 : vector<4x512xf32>
    %335 = vector.extract_strided_slice %1 {offsets = [0, 9], sizes = [4, 1], strides = [1, 1]} : vector<4x12xf32> to vector<4x1xf32>
    %336 = vector.extract_strided_slice %277 {offsets = [1, 0], sizes = [1, 512], strides = [1, 1]} : vector<4x512xf32> to vector<1x512xf32>
    %337 = vector.broadcast %335 : vector<4x1xf32> to vector<4x512xf32>
    %338 = vector.broadcast %336 : vector<1x512xf32> to vector<4x512xf32>
    %339 = arith.mulf %337, %338 : vector<4x512xf32>
    %340 = arith.addf %334, %339 : vector<4x512xf32>
    %341 = vector.extract_strided_slice %1 {offsets = [0, 10], sizes = [4, 1], strides = [1, 1]} : vector<4x12xf32> to vector<4x1xf32>
    %342 = vector.extract_strided_slice %277 {offsets = [2, 0], sizes = [1, 512], strides = [1, 1]} : vector<4x512xf32> to vector<1x512xf32>
    %343 = vector.broadcast %341 : vector<4x1xf32> to vector<4x512xf32>
    %344 = vector.broadcast %342 : vector<1x512xf32> to vector<4x512xf32>
    %345 = arith.mulf %343, %344 : vector<4x512xf32>
    %346 = arith.addf %340, %345 : vector<4x512xf32>
    %347 = vector.extract_strided_slice %1 {offsets = [0, 11], sizes = [4, 1], strides = [1, 1]} : vector<4x12xf32> to vector<4x1xf32>
    %348 = vector.extract_strided_slice %277 {offsets = [3, 0], sizes = [1, 512], strides = [1, 1]} : vector<4x512xf32> to vector<1x512xf32>
    %349 = vector.broadcast %347 : vector<4x1xf32> to vector<4x512xf32>
    %350 = vector.broadcast %348 : vector<1x512xf32> to vector<4x512xf32>
    %351 = arith.mulf %349, %350 : vector<4x512xf32>
    %352 = arith.addf %346, %351 : vector<4x512xf32>
    %353 = vector.broadcast %5 : vector<4x1xf32> to vector<4x512xf32>
    %354 = arith.addf %352, %353 : vector<4x512xf32>
    %cst_45 = arith.constant 0.00999999977 : f32
    %355 = vector.broadcast %cst_45 : f32 to vector<4x512xf32>
    %356 = arith.mulf %355, %354 : vector<4x512xf32>
    %357 = arith.maximumf %354, %356 : vector<4x512xf32>
    %358 = vector.extract_strided_slice %3 {offsets = [0, 0], sizes = [4, 1], strides = [1, 1]} : vector<4x4xf32> to vector<4x1xf32>
    %359 = vector.extract_strided_slice %357 {offsets = [0, 0], sizes = [1, 512], strides = [1, 1]} : vector<4x512xf32> to vector<1x512xf32>
    %360 = vector.broadcast %358 : vector<4x1xf32> to vector<4x512xf32>
    %361 = vector.broadcast %359 : vector<1x512xf32> to vector<4x512xf32>
    %362 = arith.mulf %360, %361 : vector<4x512xf32>
    %363 = arith.addf %273, %362 : vector<4x512xf32>
    %364 = vector.extract_strided_slice %3 {offsets = [0, 1], sizes = [4, 1], strides = [1, 1]} : vector<4x4xf32> to vector<4x1xf32>
    %365 = vector.extract_strided_slice %357 {offsets = [1, 0], sizes = [1, 512], strides = [1, 1]} : vector<4x512xf32> to vector<1x512xf32>
    %366 = vector.broadcast %364 : vector<4x1xf32> to vector<4x512xf32>
    %367 = vector.broadcast %365 : vector<1x512xf32> to vector<4x512xf32>
    %368 = arith.mulf %366, %367 : vector<4x512xf32>
    %369 = arith.addf %363, %368 : vector<4x512xf32>
    %370 = vector.extract_strided_slice %3 {offsets = [0, 2], sizes = [4, 1], strides = [1, 1]} : vector<4x4xf32> to vector<4x1xf32>
    %371 = vector.extract_strided_slice %357 {offsets = [2, 0], sizes = [1, 512], strides = [1, 1]} : vector<4x512xf32> to vector<1x512xf32>
    %372 = vector.broadcast %370 : vector<4x1xf32> to vector<4x512xf32>
    %373 = vector.broadcast %371 : vector<1x512xf32> to vector<4x512xf32>
    %374 = arith.mulf %372, %373 : vector<4x512xf32>
    %375 = arith.addf %369, %374 : vector<4x512xf32>
    %376 = vector.extract_strided_slice %3 {offsets = [0, 3], sizes = [4, 1], strides = [1, 1]} : vector<4x4xf32> to vector<4x1xf32>
    %377 = vector.extract_strided_slice %357 {offsets = [3, 0], sizes = [1, 512], strides = [1, 1]} : vector<4x512xf32> to vector<1x512xf32>
    %378 = vector.broadcast %376 : vector<4x1xf32> to vector<4x512xf32>
    %379 = vector.broadcast %377 : vector<1x512xf32> to vector<4x512xf32>
    %380 = arith.mulf %378, %379 : vector<4x512xf32>
    %381 = arith.addf %375, %380 : vector<4x512xf32>
    %382 = vector.broadcast %6 : vector<4x1xf32> to vector<4x512xf32>
    %383 = arith.addf %381, %382 : vector<4x512xf32>
    %cst_46 = arith.constant 0.00999999977 : f32
    %384 = vector.broadcast %cst_46 : f32 to vector<4x512xf32>
    %385 = arith.mulf %384, %383 : vector<4x512xf32>
    %386 = arith.maximumf %383, %385 : vector<4x512xf32>
    %387 = arith.addf %386, %279 : vector<4x512xf32>
    %388 = vector.broadcast %7 : vector<4x1xf32> to vector<4x512xf32>
    %389 = arith.mulf %388, %387 : vector<4x512xf32>
    %390 = vector.broadcast %8 : vector<4x1xf32> to vector<4x512xf32>
    %391 = arith.addf %389, %390 : vector<4x512xf32>
    %cst_47 = arith.constant 0.00999999977 : f32
    %392 = vector.broadcast %cst_47 : f32 to vector<4x512xf32>
    %393 = arith.mulf %392, %391 : vector<4x512xf32>
    %394 = arith.maximumf %391, %393 : vector<4x512xf32>
    %c0_48 = arith.constant 0 : index
    %c0_49 = arith.constant 0 : index
    %c0_50 = arith.constant 0 : index
    %395 = vector.load %arg12[%c0_48, %c0_49, %c0_50] : memref<1x4x512xf32, #tpu.memory_space<vmem>>, vector<1x4x512xf32>
    %396 = vector.shape_cast %395 : vector<1x4x512xf32> to vector<4x512xf32>
    %397 = vector.shape_cast %394 : vector<4x512xf32> to vector<1x4x512xf32>
    tpu.vector_store %arg12[%c0_48, %c0_49, %c0_50], %397 {strides = array<i32>} : memref<1x4x512xf32, #tpu.memory_space<vmem>>, vector<1x4x512xf32>,
    return
  }
  func.func @transform_0(%arg0: i32, %arg1: i32) -> (i32, i32, i32) {
    %c0_i32 = arith.constant 0 : i32
    %c0_i32_0 = arith.constant 0 : i32
    return %arg0, %c0_i32, %arg1 : i32, i32, i32
  }
  func.func @transform_1(%arg0: i32, %arg1: i32) -> (i32, i32) {
    %c0_i32 = arith.constant 0 : i32
    %c0_i32_0 = arith.constant 0 : i32
    %c0_i32_1 = arith.constant 0 : i32
    return %c0_i32, %c0_i32_0 : i32, i32
  }
  func.func @transform_2(%arg0: i32, %arg1: i32) -> (i32, i32) {
    %c0_i32 = arith.constant 0 : i32
    %c0_i32_0 = arith.constant 0 : i32
    %c0_i32_1 = arith.constant 0 : i32
    return %c0_i32, %c0_i32_0 : i32, i32
  }
  func.func @transform_3(%arg0: i32, %arg1: i32) -> (i32, i32) {
    %c0_i32 = arith.constant 0 : i32
    %c0_i32_0 = arith.constant 0 : i32
    %c0_i32_1 = arith.constant 0 : i32
    return %c0_i32, %c0_i32_0 : i32, i32
  }
  func.func @transform_4(%arg0: i32, %arg1: i32) -> (i32, i32) {
    %c0_i32 = arith.constant 0 : i32
    %c0_i32_0 = arith.constant 0 : i32
    %c0_i32_1 = arith.constant 0 : i32
    return %c0_i32, %c0_i32_0 : i32, i32
  }
  func.func @transform_5(%arg0: i32, %arg1: i32) -> (i32, i32) {
    %c0_i32 = arith.constant 0 : i32
    %c0_i32_0 = arith.constant 0 : i32
    %c0_i32_1 = arith.constant 0 : i32
    return %c0_i32, %c0_i32_0 : i32, i32
  }
  func.func @transform_6(%arg0: i32, %arg1: i32) -> (i32, i32) {
    %c0_i32 = arith.constant 0 : i32
    %c0_i32_0 = arith.constant 0 : i32
    %c0_i32_1 = arith.constant 0 : i32
    return %c0_i32, %c0_i32_0 : i32, i32
  }
  func.func @transform_7(%arg0: i32, %arg1: i32) -> (i32, i32) {
    %c0_i32 = arith.constant 0 : i32
    %c0_i32_0 = arith.constant 0 : i32
    %c0_i32_1 = arith.constant 0 : i32
    return %c0_i32, %c0_i32_0 : i32, i32
  }
  func.func @transform_8(%arg0: i32, %arg1: i32) -> (i32, i32) {
    %c0_i32 = arith.constant 0 : i32
    %c0_i32_0 = arith.constant 0 : i32
    %c0_i32_1 = arith.constant 0 : i32
    return %c0_i32, %c0_i32_0 : i32, i32
  }
  func.func @transform_9(%arg0: i32, %arg1: i32) -> (i32, i32) {
    %c0_i32 = arith.constant 0 : i32
    %c0_i32_0 = arith.constant 0 : i32
    %c0_i32_1 = arith.constant 0 : i32
    return %c0_i32, %c0_i32_0 : i32, i32
  }
  func.func @transform_10(%arg0: i32, %arg1: i32) -> (i32, i32, i32) {
    %c0_i32 = arith.constant 0 : i32
    %c0_i32_0 = arith.constant 0 : i32
    return %arg0, %c0_i32, %arg1 : i32, i32, i32
  }
}

</mosaic_0001>

<bundles_post_ra>
// kernel: tpu_custom_call.1
= control target key start
LH: loop header
LB: loop body
LE: loop exit
PB: predicated region body
PF: predicated region fallthrough
CT: control target
= control target key end

     0   :  { %s4373_s0 = inlined_call_operand.hbm [shape: f32[2,48,1024], index: 0, kind: input, shape index: {}]   ;;  %s4374_s1 = inlined_call_operand.vmem [shape: f32[4,36], index: 1, kind: input, shape index: {}]   ;;  %s4375_s2 = inlined_call_operand.vmem [shape: f32[4,12], index: 2, kind: input, shape index: {}]   ;;  %s4376_s3 = inlined_call_operand.vmem [shape: f32[4,4], index: 3, kind: input, shape index: {}]   ;;  %s4377_s4 = inlined_call_operand.vmem [shape: f32[4,4], index: 4, kind: input, shape index: {}]   ;;  %s4378_s5 = inlined_call_operand.vmem [shape: f32[4,1], index: 5, kind: input, shape index: {}]   ;;  %s4379_s6 = inlined_call_operand.vmem [shape: f32[4,1], index: 6, kind: input, shape index: {}]   ;;  %s4380_s7 = inlined_call_operand.vmem [shape: f32[4,1], index: 7, kind: input, shape index: {}]   ;;  %s4381_s8 = inlined_call_operand.vmem [shape: f32[4,1], index: 8, kind: input, shape index: {}]   ;;  %s4382_s9 = inlined_call_operand.vmem [shape: f32[4,1], index: 9, kind: input, shape index: {}]   ;;  %s4383_s10 = inlined_call_operand.hbm [shape: f32[2,4,1024], index: 10, kind: output, shape index: {}]  }
   0x1   :  { %4401 = sst [smem:[#allocation27_spill]] %s4383_s10 }
   0x2   :  { %15 = vsyncpa [#allocation3], 0 }
   0x3   :  { %17 = vsyncpa [#allocation3 + $0x1], 0 }
   0x4   :  { %18 = vsyncpa [#allocation4], 0 }
   0x5   :  { %20 = vsyncpa [#allocation4 + $0x1], 0  ;;  %s2654_s13 = smov 0   ;;  %s2656_s14 = smov 0  }
   0x6   :  { %s2658_s15 = smov 0   ;;  %s2660_s16 = smov 0  }
   0x7   :  { %s2662_s17 = smov 0   ;;  %s2664_s18 = smov 0  }
   0x8   :  { %s2666_s19 = smov 0   ;;  %s2668_s20 = smov 0  }
   0x9 LB: > { %4402 = sst [smem:[#allocation8_spill]] %s2528_s13  ;;  %s2234_s21 = sadd.s32 4294967295, %s2556_s20   ;;  %s2556_s20 = sphi %s2668_s20, %s26_s20   ;;  %s2552_s19 = sphi %s2666_s19, %s4622_s19   ;;  %s2548_s18 = sphi %s2664_s18, %s4627_s18   ;;  %s2544_s17 = sphi %s2662_s17, %s4620_s17   ;;  %s2540_s16 = sphi %s2660_s16, %s4626_s16   ;;  %s2536_s15 = sphi %s2658_s15, %s4625_s15   ;;  %s2532_s14 = sphi %s2656_s14, %s4624_s14   ;;  %s2528_s13 = sphi %s2654_s13, %s4623_s13  }
   0xa   : > { %4403 = sst [smem:[#allocation9_spill]] %s2540_s16  ;;  %s2235_s22 = sadd.s32 4294967294, %s2556_s20  }
   0xb   : > { %4404 = sst [smem:[#allocation10_spill]] %s2544_s17  ;;  %s35_s23 = sadd.s32 1, %s2548_s18 }
   0xc   : > { %4405 = sst [smem:[#allocation11_spill]] %s2552_s19  ;;  %s38_s24 = sadd.s32 1, %s2552_s19 }
   0xd   : > { %p36_p0 = scmp.ge.s32.totalorder %s35_s23, 2  ;;  %s47_s25 = sadd.s32 1, %s2536_s15 }
   0xe   : > { %p54_p1 = scmp.ne.s32.totalorder %s2536_s15, %s2532_s14  ;;  %p55_p2 = scmp.eq.s32.totalorder %s2556_s20, 0 }
   0xf   : > { %s4629_s23 = smov (%p36_p0, %s35_s23), 0  ;;  %s4631_s24 = smov (!%p36_p0, %s38_s24), %s2552_s19 }
  0x10   : > { %4406 = sst [smem:[#allocation12_spill]] %s4629_s23  ;;  %s43_s26 = ssub.s32 %s2548_s18, %s4629_s23 }
  0x11   : > { %p2707_p3 = por %p55_p2, %p54_p1  ;;  %p40_p4 = scmp.ge.s32.totalorder %s4631_s24, 2 }
  0x12   : > { %p60_p5 = scmp.ne.s32.totalorder %s2532_s14, %s2528_s13  ;;  %p61_p6 = scmp.eq.s32.totalorder %s2234_s21, 0 }
  0x13   : > { %p275_p7 = scmp.eq.s32.totalorder %s2234_s21, 3  ;;  %s4633_s24 = smov (%p40_p4, %s4631_s24), 0 }
  0x14   : > { %4408 = sst [smem:[#allocation13_spill]] %s4633_s24  ;;  %p2715_p8 = por %p61_p6, %p60_p5 }
  0x15   : > { %p2719_p9 = por %p275_p7, %p54_p1  ;;  %s42_s30 = ssub.s32 %s2552_s19, %s4633_s24 }
  0x16   : > { %p281_p10 = scmp.eq.s32.totalorder %s2235_s22, 3  ;;  %s44_s11 = sor.u32 %s43_s26, %s42_s30 }
  0x17   : > { %s4410_s29 = scalar_select %p2719_p9, 1, 0 }
  0x18   : > { %p45_p11 = scmp.eq.s32.totalorder %s44_s11, 0  ;;  %p2725_p12 = por %p281_p10, %p60_p5 }
  0x19   : > { %p2263_p13 = scmp.lt.s32.totalorder %s2556_s20, 4  ;;  %s328_s21 = sand.u32 1, %s2536_s15  }
  0x1a   : > { %s4411_s12 = scalar_select %p2725_p12, 1, 0 }
  0x1b   : > { %s2732_s23 = scalar_select %p45_p11, %s2536_s15, %s47_s25  }
  0x1c   : > { %4412 = sst [smem:[#allocation14_spill]] %s4411_s12  ;;  %s2248_s13 = smul.u32 192, %s328_s21 }
  0x1d   : > { %s2238_s10 = sshll.u32 %s2548_s18, 2  ;;  %s2249_s17 = smul.u32 48, %s2552_s19 }
  0x1e   : > { %p2738_p0 = pnand %p2263_p13, %p2707_p3  ;;  %s332_s26 = scalar_lea.vmem [#allocation2], %s2248_s13 }
  0x1f   : > { %s338_s22 = sadd.s32 %s2249_s17, %s2238_s10  ;;  %s341_s30 = sshll.u32 %s332_s26, 4  ;;  %s2742_s30 = int_to_ptr.vmem [resolvable:$true] %s341_s30 }
  0x20   : > { %s2239_s11 = sshll.u32 %s338_s22, 7  ;;  %s2750_s27 = scalar_lea.sflag [#allocation3], %s328_s21 }
  0x21   : > { %s2747_s25 = scalar_lea.hbm %s4373_s0, %s2239_s11  ;;  %p2430_p3 = pneg %p2738_p0 }
  0x22   : > { %s2428_s19 = scalar_lea.hbm %s2747_s25, 3072  ;;  %s2433_s17 = scalar_lea.hbm %s4373_s0, 12288 }
  0x23   : > { %p2429_p2 = scmp.ne.s32.totalorder %s2747_s25, %s2428_s19  ;;  %p2434_p6 = scmp.lt.u32.totalorder %s2747_s25, %s4373_s0 }
  0x24   : > { %p2435_p7 = scmp.lt.u32.totalorder %s2433_s17, %s2428_s19  ;;  %p2437_p11 = scmp.lt.u32.totalorder %s2428_s19, %s2747_s25 }
  0x25   : > { %p2431_p4 = pnand %p2430_p3, %p2429_p2 }
  0x26   : > { %p2436_p10 = por %p2435_p7, %p2434_p6 }
  0x27   : > { %p2432_p5 = pneg %p2431_p4 }
  0x28   : > { %p2438_p13 = por %p2437_p11, %p2436_p10 }
  0x2a   : > { %p2439_p1 = pnand %p2438_p13, %p2432_p5 }
  0x2c   : > { %2442 = shalt.err (!%p2439_p1)
}
  0x2d   : > { %s2443_s21 = scalar_lea.vmem %s2742_s30, 3072  ;;  %s2558_s22 = smov [#allocation2]  }
  0x2e   : > { %p2444_p2 = scmp.ne.s32.totalorder %s2742_s30, %s2443_s21  ;;  %s2448_s26 = sshll.u32 %s2558_s22, 4  ;;  %s2449_s26 = int_to_ptr.vmem [resolvable:$false] %s2448_s26 }
  0x2f   : > { %s2450_s11 = scalar_lea.vmem %s2449_s26, 6144  ;;  %p2451_p9 = scmp.lt.s32.totalorder %s2742_s30, %s2449_s26 }
  0x30   : > { %p2446_p4 = pnand %p2444_p2, %p2430_p3  ;;  %p2452_p6 = scmp.lt.s32.totalorder %s2450_s11, %s2443_s21 }
  0x32   : > { %p2447_p12 = pneg %p2446_p4  ;;  %p2453_p7 = por %p2452_p6, %p2451_p9 }
  0x34   : > { %p2454_p10 = pnand %p2453_p7, %p2447_p12 }
  0x36   : > { %2457 = shalt.err (!%p2454_p10)
}
  0x37   : > { %s2559_s19 = smov 1024   ;;  %s2560_s10 = smov 512  }
  0x38   : > { %s2561_s13 = smov 32   ;;  %p349_p1 = scmp.lt.s32.totalorder %s2556_s20, 5 }
  0x39   : > { %2258 = dma.hbm_to_vmem [thread:$0]  (!%p2738_p0), %s2747_s25, 3072, %s2742_s30, %s2750_s27, %s2559_s19, %s2560_s10, %s2561_s13  }
  0x3a   : > { %p4414_p3 = scmp.ge.s32.totalorder %s2556_s20, 1 }
  0x3c   : > { %p350_p5 = pnand %p4414_p3, %p349_p1 }
  0x3e   : > { %353 = sbr.rel (%p350_p5) target bundleno = 439 (0x1b7), region = 60 }
  0x45   : > { %s2782_s17 = sand.u32 1, %s2532_s14  }
  0x46   : > { %s2250_s24 = smul.u32 192, %s2782_s17  ;;  %s356_s12 = scalar_lea.sflag [#allocation3], %s2782_s17 }
  0x48   : > { %s2786_s21 = scalar_lea.vmem [#allocation2], %s2250_s24 }
  0x49   : > { %2519 = dma.done.wait (%p2715_p8), %s356_s12, 3072  }
  0x4a   : > { %2521 = vsyncadd (%p2715_p8), %s356_s12, 4294964224  ;;  %v4392_v0 = vmov 2   ;;  %v2563_v1 = vmov 0   ;;  %v2797_v2 = vld [vmem:[%s4374_s1] sm:$0xf]  ;;  %v4391_v3 = vmov 3   ;;  %v416_v41 = vlaneseq }
  0x4b   : > { %2370 = vset.pattern.permute.xlu1 %v4392_v0  ;;  %2368 = vset.pattern.permute.xlu0 %v2563_v1  ;;  %v2565_v4 = vmov 1   ;;  %v2566_v5 = vmov 4   ;;  %v2567_v6 = vmov 5   ;;  %v2568_v7 = vmov 6   ;;  %v2833_v24 = vld [vmem:[%s4375_s2] sm:$0xf] }
  0x4c   : > { %469 = vperm.xlu1 %2370, %v2797_v2   ;;  %413 = vperm.xlu0 %2368, %v2797_v2   ;;  %v2569_v8 = vmov 8   ;;  %v2570_v9 = vmov 7   ;;  %v2571_v10 = vmov 11   ;;  %v2572_v11 = vmov 9   ;;  %v2853_v32 = vld [vmem:[%s4376_s3] sm:$0xf] }
  0x4d   : > { %v2573_v12 = vmov 14   ;;  %v2574_v13 = vmov 10   ;;  %v2575_v14 = vmov 17   ;;  %v2576_v15 = vmov 12   ;;  %v2864_v35 = vld [vmem:[%s4377_s4] sm:$0xf] }
  0x4e   : > { %v2577_v16 = vmov 20   ;;  %v2578_v17 = vmov 13   ;;  %v2579_v18 = vmov 23   ;;  %v2580_v19 = vmov 15   ;;  %v405_v36 = vld [vmem:[%s4381_s8] sm:$0xf] }
  0x4f   : > { %v2581_v20 = vmov 26   ;;  %v2582_v21 = vmov 16   ;;  %v2583_v22 = vmov 29   ;;  %v2584_v23 = vmov 18   ;;  %v2896_v46 = vld [vmem:[%s2786_s21] sm:$0xf] }
  0x50   : > { %2371 = vset.pattern.permute.xlu1 %v4391_v3  ;;  %2369 = vset.pattern.permute.xlu0 %v2565_v4  ;;  %v2585_v25 = vmov 19   ;;  %v2586_v26 = vmov 31   ;;  %v2587_v27 = vmov 21   ;;  %v2588_v28 = vmov 22   ;;  %v2899_v47 = vld [vmem:[%s2786_s21 + $0x8] sm:$0xf] }
  0x51   : > { %497 = vperm.xlu1 %2371, %v2797_v2   ;;  %441 = vperm.xlu0 %2369, %v2797_v2   ;;  %v2589_v29 = vmov 34   ;;  %v2590_v30 = vmov 24   ;;  %v2591_v31 = vmov 25   ;;  %v2592_v33 = vmov 27   ;;  %v2904_v49 = vld [vmem:[%s2786_s21 + $0x10] sm:$0xf] }
  0x52   : > { %v2593_v34 = vmov 28   ;;  %v2594_v37 = vmov 30   ;;  %v2595_v38 = vmov 32   ;;  %v2596_v39 = vmov 33   ;;  %v2907_v50 = vld [vmem:[%s2786_s21 + $0x18] sm:$0xf] }
  0x53   : > { %v417_v43 = vshrl.u32 %v416_v41, 7  ;;  %v2597_v51 = vmov 35   ;;  %v3064_v41 = vld [vmem:[%s2786_s21 + $0x30] sm:$0xf0]  ;;  %s4614_s22 = sld [smem:[#allocation10_spill]]  ;;  %s2241_s26 = sshll.u32 %s2782_s17, 4 }
  0x54   : > { %s395_s24 = scalar_lea.vmem [#allocation5], %s2241_s26  ;;  %s4615_s28 = sld [smem:[#allocation27_spill]] }
  0x55   : > { %2372 = vset.pattern.permute.xlu1 %v2566_v5  ;;  %2373 = vset.pattern.permute.xlu0 %v2567_v6  ;;  %v2891_v44 = vsub.s32 2, %v417_v43  ;;  %v2901_v48 = vsub.s32 0, %v417_v43  ;;  %v2909_v52 = vsub.s32 3, %v417_v43  ;;  %v2916_v55 = vsub.s32 1, %v417_v43  ;;  %s2147_s12 = sshll.u32 %s395_s24, 4  ;;  %s2131_s27 = scalar_lea.sflag [#allocation4], %s2782_s17  ;;  %s4321_s12 = int_to_ptr.vmem [resolvable:$true] %s2147_s12 }
  0x56   : > { %529 = vperm.xlu1 %2372, %v2797_v2   ;;  %557 = vperm.xlu0 %2373, %v2797_v2   ;;  %v2924_v59 = vsub.s32 4, %v417_v43  ;;  %p4616_p9 = scmp.ne.s32.totalorder %s4410_s29, 0 }
  0x57   : > { %4415 = vst [vmem:[#allocation15_spill] sm:$0xff] %v2909_v52  ;;  %v475_v53 = vrot.slane %v2896_v46, %v2891_v44  ;;  %v479_v54 = vrot.slane %v2899_v47, %v2891_v44  ;;  %4416 = vst [vmem:[#allocation16_spill] sm:$0xff] %v2916_v55  ;;  %v483_v56 = vrot.slane %v2904_v49, %v2891_v44 }
  0x58   : > { %v487_v57 = vrot.slane %v2907_v50, %v2891_v44  ;;  %v419_v58 = vrot.slane %v2896_v46, %v2901_v48  ;;  %v423_v61 = vrot.slane %v2899_v47, %v2901_v48  ;;  %v427_v62 = vrot.slane %v2904_v49, %v2901_v48 }
  0x59   : > { %v431_v63 = vrot.slane %v2907_v50, %v2901_v48  ;;  %s2244_s19 = sshll.u32 %s4614_s22, 3  ;;  %s2598_s22 = smov [#allocation5]  }
  0x5a   : > { %2374 = vset.pattern.permute.xlu1 %v2568_v7  ;;  %2376 = vset.pattern.permute.xlu0 %v2569_v8  ;;  %s2462_s26 = sshll.u32 %s2598_s22, 4  ;;  %s2463_s26 = int_to_ptr.vmem [resolvable:$false] %s2462_s26 }
  0x5b   : > { %585 = vperm.xlu1 %2374, %v2797_v2   ;;  %645 = vperm.xlu0 %2376, %v2797_v2   ;;  %p2465_p11 = scmp.lt.s32.totalorder %s4321_s12, %s2463_s26 }
  0x5f   : > { %2375 = vset.pattern.permute.xlu1 %v2570_v9  ;;  %2379 = vset.pattern.permute.xlu0 %v2571_v10 }
  0x60   : > { %613 = vperm.xlu1 %2375, %v2797_v2   ;;  %729 = vperm.xlu0 %2379, %v2797_v2  }
  0x64   : > { %2377 = vset.pattern.permute.xlu1 %v2572_v11  ;;  %2382 = vset.pattern.permute.xlu0 %v2573_v12  ;;  %v2949_v12 = vld [vmem:[%s2786_s21 + $0x10] sm:$0xf0] }
  0x65   : > { %673 = vperm.xlu1 %2377, %v2797_v2   ;;  %817 = vperm.xlu0 %2382, %v2797_v2  }
  0x69   : > { %2378 = vset.pattern.permute.xlu1 %v2574_v13  ;;  %2385 = vset.pattern.permute.xlu0 %v2575_v14  ;;  %v2954_v14 = vsub.s32 6, %v417_v43 }
  0x6a   : > { %701 = vperm.xlu1 %2378, %v2797_v2   ;;  %905 = vperm.xlu0 %2385, %v2797_v2  }
  0x6e   : > { %2380 = vset.pattern.permute.xlu1 %v2576_v15  ;;  %2388 = vset.pattern.permute.xlu0 %v2577_v16  ;;  %v515_v16 = vrot.slane %v2907_v50, %v2909_v52 }
  0x6f   : > { %761 = vperm.xlu1 %2380, %v2797_v2   ;;  %993 = vperm.xlu0 %2388, %v2797_v2  }
  0x73   : > { %2381 = vset.pattern.permute.xlu1 %v2578_v17  ;;  %2391 = vset.pattern.permute.xlu0 %v2579_v18  ;;  %v447_v17 = vrot.slane %v2896_v46, %v2916_v55  ;;  %v451_v18 = vrot.slane %v2899_v47, %v2916_v55 }
  0x74   : > { %789 = vperm.xlu1 %2381, %v2797_v2   ;;  %1077 = vperm.xlu0 %2391, %v2797_v2  }
  0x78   : > { %2383 = vset.pattern.permute.xlu1 %v2580_v19  ;;  %2394 = vset.pattern.permute.xlu0 %v2581_v20  ;;  %v2964_v19 = vsub.s32 7, %v417_v43  ;;  %v455_v20 = vrot.slane %v2904_v49, %v2916_v55 }
  0x79   : > { %845 = vperm.xlu1 %2383, %v2797_v2   ;;  %1165 = vperm.xlu0 %2394, %v2797_v2  }
  0x7d   : > { %2384 = vset.pattern.permute.xlu1 %v2582_v21  ;;  %2397 = vset.pattern.permute.xlu0 %v2583_v22 }
  0x7e   : > { %877 = vperm.xlu1 %2384, %v2797_v2   ;;  %1253 = vperm.xlu0 %2397, %v2797_v2  }
  0x82   : > { %2386 = vset.pattern.permute.xlu1 %v2584_v23  ;;  %2400 = vset.pattern.permute.xlu0 %v4392_v0  ;;  %v543_v23 = vrot.slane %v2949_v12, %v2924_v59 }
  0x83   : > { %933 = vperm.xlu1 %2386, %v2797_v2   ;;  %1652 = vperm.xlu0 %2400, %v2833_v24  }
  0x87   : > { %2387 = vset.pattern.permute.xlu1 %v2585_v25  ;;  %2403 = vset.pattern.permute.xlu0 %v2586_v26  ;;  %v3067_v26 = vld [vmem:[%s2786_s21 + $0x38] sm:$0xf0] }
  0x88   : > { %961 = vperm.xlu1 %2387, %v2797_v2   ;;  %1309 = vperm.xlu0 %2403, %v2797_v2  }
  0x8c   : > { %2389 = vset.pattern.permute.xlu1 %v2587_v27  ;;  %2406 = vset.pattern.permute.xlu0 %v2567_v6  ;;  %v2940_v6 = vsub.s32 5, %v417_v43  ;;  %v3054_v27 = vld [vmem:[%s2786_s21 + $0x28] sm:$0xf0] }
  0x8d   : > { %1021 = vperm.xlu1 %2389, %v2797_v2   ;;  %1736 = vperm.xlu0 %2406, %v2833_v24  }
  0x91   : > { %2390 = vset.pattern.permute.xlu1 %v2588_v28  ;;  %2409 = vset.pattern.permute.xlu0 %v2589_v29  ;;  %v2985_v29 = vld [vmem:[%s2786_s21 + $0x20] sm:$0xf] }
  0x92   : > { %1049 = vperm.xlu1 %2390, %v2797_v2   ;;  %1397 = vperm.xlu0 %2409, %v2797_v2  }
  0x96   : > { %2392 = vset.pattern.permute.xlu1 %v2590_v30  ;;  %2412 = vset.pattern.permute.xlu0 %v2569_v8  ;;  %v507_v8 = vrot.slane %v2899_v47, %v2909_v52  ;;  %v2988_v30 = vld [vmem:[%s2786_s21 + $0x28] sm:$0xf] }
  0x97   : > { %1109 = vperm.xlu1 %2392, %v2797_v2   ;;  %1820 = vperm.xlu0 %2412, %v2833_v24  }
  0x9b   : > { %2393 = vset.pattern.permute.xlu1 %v2591_v31  ;;  %2415 = vset.pattern.permute.xlu0 %v2574_v13  ;;  %v2952_v13 = vld [vmem:[%s2786_s21 + $0x18] sm:$0xf0]  ;;  %v402_v31 = vld [vmem:[%s4378_s5] sm:$0xf] }
  0x9c   : > { %1137 = vperm.xlu1 %2393, %v2797_v2   ;;  %1876 = vperm.xlu0 %2415, %v2833_v24   ;;  %v547_v25 = vrot.slane %v2952_v13, %v2924_v59 }
  0xa0   : > { %2395 = vset.pattern.permute.xlu1 %v2592_v33  ;;  %2418 = vset.pattern.permute.xlu0 %v2563_v1  ;;  %v3051_v33 = vld [vmem:[%s2786_s21 + $0x20] sm:$0xf0] }
  0xa1   : > { %1193 = vperm.xlu1 %2395, %v2797_v2   ;;  %1471 = vperm.xlu0 %2418, %v2853_v32  }
  0xa5   : > { %2396 = vset.pattern.permute.xlu1 %v2593_v34  ;;  %2421 = vset.pattern.permute.xlu0 %v4391_v3 }
  0xa6   : > { %1225 = vperm.xlu1 %2396, %v2797_v2   ;;  %1555 = vperm.xlu0 %2421, %v2853_v32  }
  0xaa   : > { %2398 = vset.pattern.permute.xlu1 %v2563_v1  ;;  %2424 = vset.pattern.permute.xlu0 %v4392_v0 }
  0xab   : > { %1596 = vperm.xlu1 %2398, %v2833_v24   ;;  %2006 = vperm.xlu0 %2424, %v2864_v35  }
  0xaf   : > { %2399 = vset.pattern.permute.xlu1 %v2565_v4  ;;  %2427 = vset.pattern.permute.xlu0 %v2563_v1 }
  0xb0   : > { %1624 = vperm.xlu1 %2399, %v2833_v24   ;;  %2096 = vperm.xlu0 %2427, %v405_v36  }
  0xb4   : > { %2401 = vset.pattern.permute.xlu1 %v2594_v37 }
  0xb5   : > { %1281 = vperm.xlu1 %2401, %v2797_v2  }
  0xb9   : > { %2402 = vset.pattern.permute.xlu1 %v4391_v3 }
  0xba   : > { %1680 = vperm.xlu1 %2402, %v2833_v24  }
  0xbe   : > { %2404 = vset.pattern.permute.xlu1 %v2566_v5  ;;  %v2938_v5 = vld [vmem:[%s2786_s21 + $0x8] sm:$0xf0] }
  0xbf   : > { %1708 = vperm.xlu1 %2404, %v2833_v24   ;;  %v539_v22 = vrot.slane %v2938_v5, %v2924_v59 }
  0xc3   : > { %2405 = vset.pattern.permute.xlu1 %v2595_v38  ;;  %v3002_v38 = vld [vmem:[%s2786_s21 + $0x30] sm:$0xf] }
  0xc4   : > { %1341 = vperm.xlu1 %2405, %v2797_v2  }
  0xc8   : > { %2407 = vset.pattern.permute.xlu1 %v2596_v39  ;;  %v3005_v39 = vld [vmem:[%s2786_s21 + $0x38] sm:$0xf] }
  0xc9   : > { %1369 = vperm.xlu1 %2407, %v2797_v2  }
  0xcb   : > { %v2883_v40 = vpop.permute.xlu1 %469  ;;  %v414_v15 = vpop.permute.xlu0 %413 }
  0xcc   : > { %v432_v34 = vmul.f32 %v419_v58, %v414_v15  ;;  %v433_v37 = vmul.f32 %v423_v61, %v414_v15 }
  0xcd   : > { %2408 = vset.pattern.permute.xlu1 %v2568_v7  ;;  %v503_v7 = vrot.slane %v2896_v46, %v2909_v52 }
  0xce   : > { %1764 = vperm.xlu1 %2408, %v2833_v24  }
  0xd0   : > { %v2887_v42 = vpop.permute.xlu1 %497 }
  0xd1   : > { %v519_v46 = vmul.f32 %v515_v16, %v2887_v42 }
  0xd2   : > { %2410 = vset.pattern.permute.xlu1 %v2570_v9  ;;  %v511_v9 = vrot.slane %v2904_v49, %v2909_v52 }
  0xd3   : > { %1792 = vperm.xlu1 %2410, %v2833_v24  }
  0xd5   : > { %v2893_v45 = vpop.permute.xlu1 %529 }
  0xd7   : > { %2411 = vset.pattern.permute.xlu1 %v2597_v51  ;;  %v442_v51 = vpop.permute.xlu0 %441 }
  0xd8   : > { %1425 = vperm.xlu1 %2411, %v2797_v2   ;;  %v2935_v2 = vld [vmem:[%s2786_s21] sm:$0xf0]  ;;  %v460_v3 = vmul.f32 %v447_v17, %v442_v51  ;;  %v461_v36 = vmul.f32 %v451_v18, %v442_v51  ;;  %v462_v0 = vmul.f32 %v455_v20, %v442_v51 }
  0xd9   : > { %v535_v21 = vrot.slane %v2935_v2, %v2924_v59 }
  0xda   : > { %v2926_v60 = vpop.permute.xlu1 %585 }
  0xdb   : > { %v548_v49 = vmul.f32 %v535_v21, %v2893_v45  ;;  %v558_v16 = vpop.permute.xlu0 %557 }
  0xdc   : > { %2413 = vset.pattern.permute.xlu1 %v2572_v11  ;;  %v459_v11 = vrot.slane %v2907_v50, %v2916_v55 }
  0xdd   : > { %1848 = vperm.xlu1 %2413, %v2833_v24  }
  0xde   : > { %v463_v17 = vmul.f32 %v459_v11, %v442_v51  ;;  %v464_v11 = vadd.f32 %v460_v3, %v432_v34  ;;  %v465_v51 = vadd.f32 %v461_v36, %v433_v37  ;;  %v488_v34 = vmul.f32 %v475_v53, %v2883_v40  ;;  %v3125_v3 = vld [vmem:[%s2786_s21 + $0x50] sm:$0xf] }
  0xdf   : > { %v2982_v28 = vpop.permute.xlu1 %613  ;;  %v490_v53 = vmul.f32 %v483_v56, %v2883_v40  ;;  %v863_v56 = vrot.slane %v3067_v26, %v2964_v19 }
  0xe0   : > { %v492_v37 = vadd.f32 %v488_v34, %v464_v11 }
  0xe1   : > { %2414 = vset.pattern.permute.xlu1 %v2563_v1 }
  0xe2   : > { %1454 = vperm.xlu1 %2414, %v402_v31   ;;  %v434_v31 = vmul.f32 %v427_v62, %v414_v15 }
  0xe4   : > { %v3036_v43 = vpop.permute.xlu1 %673  ;;  %v466_v18 = vadd.f32 %v462_v0, %v434_v31  ;;  %v489_v0 = vmul.f32 %v479_v54, %v2883_v40  ;;  %v3119_v31 = vld [vmem:[%s2786_s21 + $0x40] sm:$0xf] }
  0xe5   : > { %v883_v54 = vrot.slane %v3119_v31, %v2901_v48 }
  0xe6   : > { %2416 = vset.pattern.permute.xlu1 %v2571_v10  ;;  %v435_v10 = vmul.f32 %v431_v63, %v414_v15  ;;  %v3122_v15 = vld [vmem:[%s2786_s21 + $0x48] sm:$0xf]  ;;  %v493_v61 = vadd.f32 %v489_v0, %v465_v51  ;;  %v494_v63 = vadd.f32 %v490_v53, %v466_v18  ;;  %v518_v51 = vmul.f32 %v511_v9, %v2887_v42 }
  0xe7   : > { %1904 = vperm.xlu1 %2416, %v2833_v24   ;;  %v403_v24 = vld [vmem:[%s4379_s6] sm:$0xf]  ;;  %v550_v9 = vmul.f32 %v543_v23, %v2893_v45  ;;  %v4419_v53 = vrot.slane %v2938_v5, %v2940_v6  ;;  %v4420_v23 = vrot.slane %v2949_v12, %v2940_v6 }
  0xe8   : > { %v467_v36 = vadd.f32 %v463_v17, %v435_v10  ;;  %v3138_v17 = vld [vmem:[%s2786_s21 + $0x58] sm:$0xf]  ;;  %v887_v10 = vrot.slane %v3122_v15, %v2901_v48  ;;  %v522_v50 = vadd.f32 %v518_v51, %v494_v63  ;;  %v3230_v63 = vld [vmem:[%s2786_s21 + $0x58] sm:$0xf0] }
  0xe9   : > { %v3084_v20 = vpop.permute.xlu1 %701 }
  0xeb   : > { %2417 = vset.pattern.permute.xlu1 %v2563_v1 }
  0xec   : > { %1933 = vperm.xlu1 %2417, %v403_v24   ;;  %v491_v24 = vmul.f32 %v487_v57, %v2883_v40  ;;  %v516_v40 = vmul.f32 %v503_v7, %v2887_v42  ;;  %v517_v57 = vmul.f32 %v507_v8, %v2887_v42  ;;  %v549_v42 = vmul.f32 %v539_v22, %v2893_v45 }
  0xed   : > { %v551_v22 = vmul.f32 %v547_v25, %v2893_v45  ;;  %v3214_v25 = vld [vmem:[%s2786_s21 + $0x40] sm:$0xf0]  ;;  %v554_v45 = vadd.f32 %v550_v9, %v522_v50  ;;  %v4422_v50 = vrot.slane %v2935_v2, %v2954_v14 }
  0xee   : > { %v3144_v62 = vpop.permute.xlu1 %761  ;;  %v495_v18 = vadd.f32 %v491_v24, %v467_v36  ;;  %v520_v8 = vadd.f32 %v516_v40, %v492_v37  ;;  %v521_v34 = vadd.f32 %v517_v57, %v493_v61  ;;  %v4417_v37 = vmov 2   ;;  %v3217_v57 = vld [vmem:[%s2786_s21 + $0x48] sm:$0xf0]  ;;  %v3227_v40 = vld [vmem:[%s2786_s21 + $0x50] sm:$0xf0] }
  0xef   : > { %v577_v24 = vmul.f32 %v4419_v53, %v558_v16  ;;  %v4421_v53 = vrot.slane %v2952_v13, %v2940_v6 }
  0xf0   : > { %2419 = vset.pattern.permute.xlu1 %v2565_v4  ;;  %v523_v36 = vadd.f32 %v519_v46, %v495_v18  ;;  %v552_v18 = vadd.f32 %v548_v49, %v520_v8  ;;  %v553_v51 = vadd.f32 %v549_v42, %v521_v34  ;;  %v4418_v46 = vrot.slane %v2935_v2, %v2940_v6 }
  0xf1   : > { %1499 = vperm.xlu1 %2419, %v2853_v32   ;;  %v578_v8 = vmul.f32 %v4420_v23, %v558_v16  ;;  %v604_v49 = vmul.f32 %v4422_v50, %v2926_v60  ;;  %v4423_v23 = vrot.slane %v2938_v5, %v2954_v14 }
  0xf2   : > { %v555_v42 = vadd.f32 %v551_v22, %v523_v36  ;;  %v4424_v36 = vrot.slane %v2949_v12, %v2954_v14 }
  0xf3   : > { %v3190_v61 = vpop.permute.xlu1 %789  ;;  %v605_v9 = vmul.f32 %v4423_v23, %v2926_v60  ;;  %v582_v34 = vadd.f32 %v578_v8, %v554_v45  ;;  %v4426_v45 = vrot.slane %v2935_v2, %v2964_v19  ;;  %v4427_v23 = vrot.slane %v2938_v5, %v2964_v19 }
  0xf5   : > { %2420 = vset.pattern.permute.xlu1 %v4417_v37  ;;  %v576_v37 = vmul.f32 %v4418_v46, %v558_v16  ;;  %v632_v8 = vmul.f32 %v4426_v45, %v2982_v28 }
  0xf6   : > { %1527 = vperm.xlu1 %2420, %v2853_v32   ;;  %v579_v32 = vmul.f32 %v4421_v53, %v558_v16  ;;  %v581_v53 = vadd.f32 %v577_v24, %v553_v51  ;;  %v606_v16 = vmul.f32 %v4424_v36, %v2926_v60  ;;  %v633_v36 = vmul.f32 %v4427_v23, %v2982_v28  ;;  %v646_v24 = vpop.permute.xlu0 %645 }
  0xf7   : > { %v580_v22 = vadd.f32 %v576_v37, %v552_v18  ;;  %v4425_v37 = vrot.slane %v2952_v13, %v2954_v14 }
  0xf8   : > { %v3242_v46 = vpop.permute.xlu1 %845  ;;  %v583_v51 = vadd.f32 %v579_v32, %v555_v42  ;;  %v4428_v42 = vrot.slane %v2949_v12, %v2964_v19  ;;  %v609_v45 = vadd.f32 %v605_v9, %v581_v53  ;;  %v4429_v12 = vrot.slane %v2952_v13, %v2964_v19  ;;  %v3316_v13 = vld [vmem:[%s2786_s21 + $0x68] sm:$0xf] }
  0xf9   : > { %v607_v50 = vmul.f32 %v4425_v37, %v2926_v60  ;;  %v608_v37 = vadd.f32 %v604_v49, %v580_v22  ;;  %v610_v21 = vadd.f32 %v606_v16, %v582_v34  ;;  %v4430_v60 = vrot.slane %v2985_v29, %v2901_v48  ;;  %v3313_v22 = vld [vmem:[%s2786_s21 + $0x60] sm:$0xf] }
  0xfa   : > { %2422 = vset.pattern.permute.xlu1 %v2563_v1  ;;  %v634_v32 = vmul.f32 %v4428_v42, %v2982_v28  ;;  %v635_v23 = vmul.f32 %v4429_v12, %v2982_v28  ;;  %v637_v12 = vadd.f32 %v633_v36, %v609_v45  ;;  %v4431_v34 = vrot.slane %v2988_v30, %v2901_v48 }
  0xfb   : > { %1950 = vperm.xlu1 %2422, %v2864_v35   ;;  %v664_v2 = vmul.f32 %v4430_v60, %v646_v24  ;;  %v611_v28 = vadd.f32 %v607_v50, %v583_v51  ;;  %v636_v53 = vadd.f32 %v632_v8, %v608_v37  ;;  %v3326_v60 = vld [vmem:[%s2786_s21 + $0x78] sm:$0xf]  ;;  %v4432_v9 = vrot.slane %v3002_v38, %v2901_v48 }
  0xfc   : > { %v665_v16 = vmul.f32 %v4431_v34, %v646_v24  ;;  %v638_v49 = vadd.f32 %v634_v32, %v610_v21  ;;  %v4433_v36 = vrot.slane %v3005_v39, %v2901_v48  ;;  %v4434_v21 = vrot.slane %v2985_v29, %v2916_v55 }
  0xfd   : > { %v3290_v18 = vpop.permute.xlu1 %877  ;;  %v666_v42 = vmul.f32 %v4432_v9, %v646_v24  ;;  %v639_v8 = vadd.f32 %v635_v23, %v611_v28  ;;  %v668_v28 = vadd.f32 %v664_v2, %v636_v53  ;;  %v4435_v9 = vrot.slane %v2988_v30, %v2916_v55 }
  0xfe   : > { %v667_v37 = vmul.f32 %v4433_v36, %v646_v24  ;;  %v669_v36 = vadd.f32 %v665_v16, %v637_v12  ;;  %v692_v50 = vmul.f32 %v4434_v21, %v3036_v43  ;;  %v4436_v51 = vmov 3  }
  0xff   : > { %2423 = vset.pattern.permute.xlu1 %v2565_v4  ;;  %v3323_v4 = vld [vmem:[%s2786_s21 + $0x70] sm:$0xf]  ;;  %v693_v32 = vmul.f32 %v4435_v9, %v3036_v43  ;;  %v670_v34 = vadd.f32 %v666_v42, %v638_v49  ;;  %v4437_v23 = vrot.slane %v3002_v38, %v2916_v55  ;;  %v4438_v16 = vrot.slane %v3005_v39, %v2916_v55  ;;  %v730_v9 = vpop.permute.xlu0 %729 }
 0x100   : > { %1978 = vperm.xlu1 %2423, %v2864_v35   ;;  %v671_v12 = vadd.f32 %v667_v37, %v639_v8  ;;  %v4439_v42 = vrot.slane %v2985_v29, %v2891_v44  ;;  %v4441_v8 = vrot.slane %v3002_v38, %v2891_v44  ;;  %v696_v53 = vadd.f32 %v692_v50, %v668_v28  ;;  %v3412_v28 = vld [vmem:[%s2786_s21 + $0x60] sm:$0xf0] }
 0x101   : > { %v694_v24 = vmul.f32 %v4437_v23, %v3036_v43  ;;  %v697_v2 = vadd.f32 %v693_v32, %v669_v36  ;;  %v3415_v36 = vld [vmem:[%s2786_s21 + $0x68] sm:$0xf0]  ;;  %v4445_v32 = vrot.slane %v3002_v38, %v2909_v52 }
 0x102   : > { %v3338_v45 = vpop.permute.xlu1 %933  ;;  %v720_v49 = vmul.f32 %v4439_v42, %v3084_v20  ;;  %v722_v37 = vmul.f32 %v4441_v8, %v3084_v20  ;;  %v4442_v8 = vrot.slane %v3005_v39, %v2891_v44 }
 0x103   : > { %v698_v7 = vadd.f32 %v694_v24, %v670_v34  ;;  %v4444_v34 = vrot.slane %v2988_v30, %v2909_v52  ;;  %v3421_v24 = vld [vmem:[%s2786_s21 + $0x70] sm:$0xf0]  ;;  %v750_v50 = vmul.f32 %v4445_v32, %v730_v9 }
 0x104   : > { %2425 = vset.pattern.permute.xlu1 %v4436_v51  ;;  %v695_v51 = vmul.f32 %v4438_v16, %v3036_v43  ;;  %v404_v43 = vld [vmem:[%s4380_s7] sm:$0xf]  ;;  %v723_v5 = vmul.f32 %v4442_v8, %v3084_v20  ;;  %v4443_v16 = vrot.slane %v2985_v29, %v2909_v52  ;;  %v724_v8 = vadd.f32 %v720_v49, %v696_v53  ;;  %v3468_v49 = vld [vmem:[%s2786_s21 + $0x90] sm:$0xf0] }
 0x105   : > { %2034 = vperm.xlu1 %2425, %v2864_v35   ;;  %v4440_v35 = vrot.slane %v2988_v30, %v2891_v44  ;;  %v749_v29 = vmul.f32 %v4444_v34, %v730_v9 }
 0x106   : > { %v748_v42 = vmul.f32 %v4443_v16, %v730_v9  ;;  %v726_v16 = vadd.f32 %v722_v37, %v698_v7  ;;  %v4446_v7 = vrot.slane %v3005_v39, %v2909_v52 }
 0x107   : > { %v721_v21 = vmul.f32 %v4440_v35, %v3084_v20  ;;  %v3386_v23 = vpop.permute.xlu1 %961  ;;  %v699_v20 = vadd.f32 %v695_v51, %v671_v12  ;;  %v406_v12 = vld [vmem:[%s4382_s9] sm:$0xf] }
 0x108   : > { %v751_v51 = vmul.f32 %v4446_v7, %v730_v9  ;;  %v4448_v7 = vrot.slane %v3054_v27, %v2924_v59  ;;  %v754_v30 = vadd.f32 %v750_v50, %v726_v16  ;;  %v4451_v50 = vrot.slane %v3051_v33, %v2940_v6  ;;  %v818_v9 = vpop.permute.xlu0 %817 }
 0x109   : > { %2426 = vset.pattern.permute.xlu1 %v2563_v1  ;;  %v725_v0 = vadd.f32 %v721_v21, %v697_v2  ;;  %v3424_v1 = vld [vmem:[%s2786_s21 + $0x78] sm:$0xf0]  ;;  %v727_v53 = vadd.f32 %v723_v5, %v699_v20  ;;  %v4447_v20 = vrot.slane %v3051_v33, %v2924_v59  ;;  %v3462_v5 = vld [vmem:[%s2786_s21 + $0x80] sm:$0xf0]  ;;  %v3465_v21 = vld [vmem:[%s2786_s21 + $0x88] sm:$0xf0] }
 0x10a   : > { %2063 = vperm.xlu1 %2426, %v404_v43   ;;  %v752_v43 = vadd.f32 %v748_v42, %v724_v8  ;;  %v781_v37 = vmul.f32 %v4448_v7, %v3144_v62  ;;  %v4450_v7 = vrot.slane %v3067_v26, %v2924_v59  ;;  %v808_v16 = vmul.f32 %v4451_v50, %v3190_v61 }
 0x10b   : > { %v753_v32 = vadd.f32 %v749_v29, %v725_v0  ;;  %v780_v34 = vmul.f32 %v4447_v20, %v3144_v62  ;;  %v4449_v0 = vrot.slane %v3064_v41, %v2924_v59  ;;  %v3479_v20 = vld [vmem:[%s2786_s21 + $0x98] sm:$0xf0] }
 0x10c   : > { %v3439_v38 = vpop.permute.xlu1 %1021  ;;  %v783_v2 = vmul.f32 %v4450_v7, %v3144_v62 }
 0x10d   : > { %v782_v42 = vmul.f32 %v4449_v0, %v3144_v62  ;;  %v4452_v0 = vrot.slane %v3054_v27, %v2940_v6  ;;  %v784_v39 = vadd.f32 %v780_v34, %v752_v43  ;;  %v785_v35 = vadd.f32 %v781_v37, %v753_v32 }
 0x10e   : > { %2105 = vperm.xlu1 %2426, %v406_v12   ;;  %v755_v12 = vadd.f32 %v751_v51, %v727_v53  ;;  %v4453_v53 = vrot.slane %v3064_v41, %v2940_v6  ;;  %v4455_v62 = vrot.slane %v3051_v33, %v2954_v14 }
 0x10f   : > { %v809_v8 = vmul.f32 %v4452_v0, %v3190_v61  ;;  %v4454_v0 = vrot.slane %v3067_v26, %v2940_v6  ;;  %v786_v11 = vadd.f32 %v782_v42, %v754_v30  ;;  %v812_v32 = vadd.f32 %v808_v16, %v784_v39 }
 0x110   : > { %v810_v51 = vmul.f32 %v4453_v53, %v3190_v61  ;;  %v836_v58 = vmul.f32 %v4455_v62, %v818_v9  ;;  %v787_v37 = vadd.f32 %v783_v2, %v755_v12  ;;  %v4457_v30 = vrot.slane %v3064_v41, %v2954_v14 }
 0x111   : > { %v3497_v29 = vpop.permute.xlu1 %1049  ;;  %v811_v47 = vmul.f32 %v4454_v0, %v3190_v61  ;;  %v813_v34 = vadd.f32 %v809_v8, %v785_v35  ;;  %v4456_v61 = vrot.slane %v3054_v27, %v2954_v14  ;;  %v4458_v2 = vrot.slane %v3067_v26, %v2954_v14  ;;  %v3784_v8 = vld [vmem:[%s2786_s21 + $0xb0] sm:$0xf] }
 0x112   : > { %v814_v50 = vadd.f32 %v810_v51, %v786_v11  ;;  %v838_v42 = vmul.f32 %v4457_v30, %v818_v9  ;;  %v840_v51 = vadd.f32 %v836_v58, %v812_v32  ;;  %v4466_v58 = vrot.slane %v3125_v3, %v2916_v55  ;;  %v3787_v11 = vld [vmem:[%s2786_s21 + $0xb8] sm:$0xf] }
 0x113   : > { %v837_v0 = vmul.f32 %v4456_v61, %v818_v9  ;;  %v815_v7 = vadd.f32 %v811_v47, %v787_v37  ;;  %v839_v35 = vmul.f32 %v4458_v2, %v818_v9  ;;  %v4459_v61 = vrot.slane %v3051_v33, %v2964_v19  ;;  %v3608_v9 = vld [vmem:[%s2786_s21 + $0xb0] sm:$0xf0]  ;;  %4490 = vst [vmem:[#allocation19_spill] sm:$0xff] %v3787_v11 }
 0x114   : > { %v4460_v2 = vrot.slane %v3054_v27, %v2964_v19  ;;  %v842_v62 = vadd.f32 %v838_v42, %v814_v50  ;;  %v4461_v47 = vrot.slane %v3064_v41, %v2964_v19  ;;  %v867_v33 = vmul.f32 %v863_v56, %v3242_v46  ;;  %v906_v50 = vpop.permute.xlu0 %905 }
 0x115   : > { %v841_v37 = vadd.f32 %v837_v0, %v813_v34  ;;  %v864_v30 = vmul.f32 %v4459_v61, %v3242_v46  ;;  %v843_v34 = vadd.f32 %v839_v35, %v815_v7  ;;  %v896_v27 = vmul.f32 %v883_v54, %v3290_v18 }
 0x116   : > { %v3531_v39 = vpop.permute.xlu1 %1109  ;;  %v865_v53 = vmul.f32 %v4460_v2, %v3242_v46  ;;  %v866_v43 = vmul.f32 %v4461_v47, %v3242_v46  ;;  %v897_v41 = vmul.f32 %v887_v10, %v3290_v18  ;;  %v4462_v7 = vrot.slane %v3125_v3, %v2901_v48  ;;  %v3652_v46 = vld [vmem:[%s2786_s21 + $0x90] sm:$0xf] }
 0x117   : > { %v868_v10 = vadd.f32 %v864_v30, %v840_v51  ;;  %v4463_v35 = vrot.slane %v3138_v17, %v2901_v48  ;;  %v871_v30 = vadd.f32 %v867_v33, %v843_v34  ;;  %v926_v51 = vmul.f32 %v4466_v58, %v906_v50  ;;  %v3646_v34 = vld [vmem:[%s2786_s21 + $0x80] sm:$0xf] }
 0x118   : > { %v898_v0 = vmul.f32 %v4462_v7, %v3290_v18  ;;  %v869_v42 = vadd.f32 %v865_v53, %v841_v37  ;;  %v870_v2 = vadd.f32 %v866_v43, %v842_v62  ;;  %v4464_v7 = vrot.slane %v3119_v31, %v2916_v55  ;;  %v3599_v53 = vld [vmem:[%s2786_s21 + $0xa0] sm:$0xf0]  ;;  %v3602_v37 = vld [vmem:[%s2786_s21 + $0xa8] sm:$0xf0]  ;;  %v994_v56 = vpop.permute.xlu0 %993 }
 0x119   : > { %v899_v47 = vmul.f32 %v4463_v35, %v3290_v18  ;;  %v900_v18 = vadd.f32 %v896_v27, %v868_v10  ;;  %v4465_v43 = vrot.slane %v3122_v15, %v2916_v55  ;;  %v4467_v27 = vrot.slane %v3138_v17, %v2916_v55 }
 0x11a   : > { %v924_v32 = vmul.f32 %v4464_v7, %v906_v50  ;;  %v901_v35 = vadd.f32 %v897_v41, %v869_v42  ;;  %v3611_v7 = vld [vmem:[%s2786_s21 + $0xb8] sm:$0xf0]  ;;  %v902_v61 = vadd.f32 %v898_v0, %v870_v2  ;;  %v4469_v42 = vrot.slane %v3122_v15, %v2891_v44  ;;  %v3649_v2 = vld [vmem:[%s2786_s21 + $0x88] sm:$0xf] }
 0x11b   : > { %v3577_v26 = vpop.permute.xlu1 %1137  ;;  %v925_v62 = vmul.f32 %v4465_v43, %v906_v50  ;;  %v903_v33 = vadd.f32 %v899_v47, %v871_v30  ;;  %v927_v41 = vmul.f32 %v4467_v27, %v906_v50  ;;  %v4468_v27 = vrot.slane %v3119_v31, %v2891_v44 }
 0x11c   : > { %v928_v30 = vadd.f32 %v924_v32, %v900_v18  ;;  %v953_v0 = vmul.f32 %v4469_v42, %v3338_v45  ;;  %v930_v47 = vadd.f32 %v926_v51, %v902_v61  ;;  %v4470_v32 = vrot.slane %v3125_v3, %v2891_v44 }
 0x11d   : > { %v929_v43 = vadd.f32 %v925_v62, %v901_v35  ;;  %v952_v58 = vmul.f32 %v4468_v27, %v3338_v45  ;;  %v3663_v27 = vld [vmem:[%s2786_s21 + $0x98] sm:$0xf]  ;;  %v931_v42 = vadd.f32 %v927_v41, %v903_v33  ;;  %v4471_v50 = vrot.slane %v3138_v17, %v2891_v44 }
 0x11e   : > { %v954_v18 = vmul.f32 %v4470_v32, %v3338_v45  ;;  %v4472_v61 = vrot.slane %v3119_v31, %v2909_v52  ;;  %v4473_v32 = vrot.slane %v3122_v15, %v2909_v52  ;;  %v4474_v33 = vrot.slane %v3125_v3, %v2909_v52  ;;  %v1078_v3 = vpop.permute.xlu0 %1077 }
 0x11f   : > { %v955_v54 = vmul.f32 %v4471_v50, %v3338_v45  ;;  %v957_v15 = vadd.f32 %v953_v0, %v929_v43  ;;  %v4476_v45 = vrot.slane %v3214_v25, %v2924_v59 }
 0x120   : > { %v3623_v10 = vpop.permute.xlu1 %1193  ;;  %v980_v51 = vmul.f32 %v4472_v61, %v3386_v23  ;;  %v981_v35 = vmul.f32 %v4473_v32, %v3386_v23  ;;  %v982_v41 = vmul.f32 %v4474_v33, %v3386_v23  ;;  %v956_v61 = vadd.f32 %v952_v58, %v928_v30 }
 0x121   : > { %v4475_v32 = vrot.slane %v3138_v17, %v2909_v52  ;;  %v958_v33 = vadd.f32 %v954_v18, %v930_v47  ;;  %v1012_v12 = vmul.f32 %v4476_v45, %v994_v56  ;;  %v959_v0 = vadd.f32 %v955_v54, %v931_v42 }
 0x122   : > { %v984_v30 = vadd.f32 %v980_v51, %v956_v61  ;;  %v985_v43 = vadd.f32 %v981_v35, %v957_v15  ;;  %v4477_v17 = vrot.slane %v3217_v57, %v2924_v59  ;;  %v4478_v47 = vrot.slane %v3227_v40, %v2924_v59  ;;  %v3741_v15 = vpop.permute.xlu0 %1165 }
 0x123   : > { %v983_v16 = vmul.f32 %v4475_v32, %v3386_v23  ;;  %v986_v32 = vadd.f32 %v982_v41, %v958_v33  ;;  %v4479_v54 = vrot.slane %v3230_v63, %v2924_v59  ;;  %v4489_v41 = vrot.slane %v3230_v63, %v2954_v14 }
 0x124   : > { %v1013_v23 = vmul.f32 %v4477_v17, %v994_v56  ;;  %v1014_v18 = vmul.f32 %v4478_v47, %v994_v56  ;;  %v1016_v33 = vadd.f32 %v1012_v12, %v984_v30  ;;  %v4481_v17 = vrot.slane %v3214_v25, %v2940_v6  ;;  %v3760_v12 = vld [vmem:[%s2786_s21 + $0xa0] sm:$0xf]  ;;  %v3763_v30 = vld [vmem:[%s2786_s21 + $0xa8] sm:$0xf]  ;;  %s4613_s21 = sld [smem:[#allocation9_spill]] }
 0x125   : > { %v3681_v62 = vpop.permute.xlu1 %1225  ;;  %v987_v58 = vadd.f32 %v983_v16, %v959_v0  ;;  %v1015_v35 = vmul.f32 %v4479_v54, %v994_v56  ;;  %v4482_v54 = vrot.slane %v3217_v57, %v2940_v6  ;;  %v4483_v16 = vrot.slane %v3227_v40, %v2940_v6 }
 0x126   : > { %v1017_v0 = vadd.f32 %v1013_v23, %v985_v43  ;;  %v1040_v47 = vmul.f32 %v4481_v17, %v3439_v38  ;;  %v1018_v45 = vadd.f32 %v1014_v18, %v986_v32  ;;  %v4484_v23 = vrot.slane %v3230_v63, %v2940_v6 }
 0x127   : > { %v1041_v31 = vmul.f32 %v4482_v54, %v3439_v38  ;;  %v1042_v50 = vmul.f32 %v4483_v16, %v3439_v38  ;;  %v1019_v43 = vadd.f32 %v1015_v35, %v987_v58  ;;  %v4485_v18 = vrot.slane %v3214_v25, %v2954_v14 }
 0x128   : > { %v1043_v32 = vmul.f32 %v4484_v23, %v3439_v38  ;;  %v4486_v17 = vrot.slane %v3217_v57, %v2954_v14  ;;  %v4487_v58 = vrot.slane %v3227_v40, %v2954_v14  ;;  %v1044_v56 = vadd.f32 %v1040_v47, %v1016_v33 }
 0x129   : > { %v1068_v16 = vmul.f32 %v4485_v18, %v3497_v29  ;;  %v1045_v61 = vadd.f32 %v1041_v31, %v1017_v0  ;;  %v1071_v51 = vmul.f32 %v4489_v41, %v3497_v29  ;;  %v1046_v23 = vadd.f32 %v1042_v50, %v1018_v45 }
 0x12a   : > { %v3715_v42 = vpop.permute.xlu1 %1596  ;;  %v1069_v54 = vmul.f32 %v4486_v17, %v3497_v29  ;;  %v1070_v35 = vmul.f32 %v4487_v58, %v3497_v29  ;;  %v4491_v18 = vrot.slane %v3214_v25, %v2964_v19  ;;  %v1254_v17 = vpop.permute.xlu0 %1253  ;;  %v1047_v29 = vadd.f32 %v1043_v32, %v1019_v43  ;;  %s2243_s11 = sshll.u32 %s4613_s21, 2  ;;  %s2458_s21 = scalar_lea.vmem %s4321_s12, 256 }
 0x12b   : > { %4480 = vst [vmem:[#allocation17_spill] sm:$0xff] %v3715_v42  ;;  %v1072_v41 = vadd.f32 %v1068_v16, %v1044_v56  ;;  %v4492_v47 = vrot.slane %v3217_v57, %v2964_v19  ;;  %v4493_v50 = vrot.slane %v3227_v40, %v2964_v19  ;;  %v4494_v56 = vrot.slane %v3230_v63, %v2964_v19  ;;  %s2143_s10 = sadd.s32 %s2244_s19, %s2243_s11  ;;  %p2459_p8 = scmp.ne.s32.totalorder %s4321_s12, %s2458_s21 }
 0x12c   : > { %v1096_v42 = vmul.f32 %v4491_v18, %v1078_v3  ;;  %v1073_v0 = vadd.f32 %v1069_v54, %v1045_v61  ;;  %v1075_v31 = vadd.f32 %v1071_v51, %v1047_v29  ;;  %v4497_v51 = vrot.slane %v3323_v4, %v2901_v48  ;;  %s2245_s13 = sshll.u32 %s2143_s10, 6  ;;  %s2464_s11 = scalar_lea.vmem %s2463_s26, 512 }
 0x12d   : > { %v1097_v58 = vmul.f32 %v4492_v47, %v1078_v3  ;;  %v1098_v25 = vmul.f32 %v4493_v50, %v1078_v3  ;;  %v1099_v61 = vmul.f32 %v4494_v56, %v1078_v3  ;;  %v4496_v47 = vrot.slane %v3316_v13, %v2901_v48  ;;  %s4319_s25 = scalar_lea.hbm %s4615_s28, %s2245_s13  ;;  %p2460_p12 = pnand %p2459_p8, %p4616_p9 }
 0x12e   : > { %v1653_v32 = vpop.permute.xlu0 %1652  ;;  %v1100_v3 = vadd.f32 %v1096_v42, %v1072_v41  ;;  %v1130_v54 = vmul.f32 %v4497_v51, %v3531_v39  ;;  %v4500_v51 = vrot.slane %v3316_v13, %v2916_v55  ;;  %v4516_v33 = vrot.slane %v3313_v22, %v2909_v52  ;;  %p2466_p13 = scmp.lt.s32.totalorder %s2464_s11, %s2458_s21 }
 0x12f   : > { %v3769_v38 = vpop.permute.xlu1 %1624  ;;  %v1129_v50 = vmul.f32 %v4496_v47, %v3531_v39  ;;  %v1103_v41 = vadd.f32 %v1099_v61, %v1075_v31  ;;  %p2461_p0 = pneg %p2460_p12 }
 0x130   : > { %4488 = vst [vmem:[#allocation18_spill] sm:$0xff] %v3769_v38  ;;  %v1074_v38 = vadd.f32 %v1070_v35, %v1046_v23  ;;  %v1101_v35 = vadd.f32 %v1097_v58, %v1073_v0  ;;  %v4495_v23 = vrot.slane %v3313_v22, %v2901_v48  ;;  %v4498_v0 = vrot.slane %v3326_v60, %v2901_v48  ;;  %p2467_p2 = por %p2466_p13, %p2465_p11 }
 0x131   : > { %v1157_v47 = vmul.f32 %v4500_v51, %v3577_v26  ;;  %v4501_v58 = vrot.slane %v3323_v4, %v2916_v55  ;;  %v4502_v51 = vrot.slane %v3326_v60, %v2916_v55 }
 0x132   : > { %v1128_v29 = vmul.f32 %v4495_v23, %v3531_v39  ;;  %v1102_v56 = vadd.f32 %v1098_v25, %v1074_v38  ;;  %v1131_v23 = vmul.f32 %v4498_v0, %v3531_v39  ;;  %v4499_v38 = vrot.slane %v3313_v22, %v2916_v55  ;;  %v1310_v0 = vpop.permute.xlu0 %1309  ;;  %p2468_p4 = pnand %p2467_p2, %p2461_p0 }
 0x133   : > { %v1158_v31 = vmul.f32 %v4501_v58, %v3577_v26  ;;  %v1133_v63 = vadd.f32 %v1129_v50, %v1101_v35  ;;  %v1159_v16 = vmul.f32 %v4502_v51, %v3577_v26  ;;  %v4503_v39 = vrot.slane %v3313_v22, %v2891_v44 }
 0x134   : > { %v3809_v43 = vpop.permute.xlu1 %1281  ;;  %v1156_v25 = vmul.f32 %v4499_v38, %v3577_v26  ;;  %v1132_v42 = vadd.f32 %v1128_v29, %v1100_v3  ;;  %v1134_v40 = vadd.f32 %v1130_v54, %v1102_v56  ;;  %v1135_v35 = vadd.f32 %v1131_v23, %v1103_v41 }
 0x135   : > { %v1184_v57 = vmul.f32 %v4503_v39, %v3741_v15  ;;  %v1161_v50 = vadd.f32 %v1157_v47, %v1133_v63  ;;  %v4504_v26 = vrot.slane %v3316_v13, %v2891_v44  ;;  %v4505_v39 = vrot.slane %v3323_v4, %v2891_v44 }
 0x136   : > { %v1160_v29 = vadd.f32 %v1156_v25, %v1132_v42  ;;  %v1162_v56 = vadd.f32 %v1158_v31, %v1134_v40  ;;  %v4506_v38 = vrot.slane %v3326_v60, %v2891_v44  ;;  %v1163_v63 = vadd.f32 %v1159_v16, %v1135_v35  ;;  %v1737_v42 = vpop.permute.xlu0 %1736 }
 0x137   : > { %v1185_v54 = vmul.f32 %v4504_v26, %v3741_v15  ;;  %v1186_v51 = vmul.f32 %v4505_v39, %v3741_v15  ;;  %v4507_v41 = vrot.slane %v3412_v28, %v2940_v6  ;;  %v4508_v40 = vrot.slane %v3415_v36, %v2940_v6 }
 0x138   : > { %v1187_v58 = vmul.f32 %v4506_v38, %v3741_v15  ;;  %v4509_v47 = vrot.slane %v3421_v24, %v2940_v6  ;;  %v4510_v15 = vrot.slane %v3424_v1, %v2940_v6  ;;  %v4511_v16 = vrot.slane %v3462_v5, %v2954_v14 }
 0x139   : > { %v3855_v61 = vpop.permute.xlu1 %1680  ;;  %v1272_v23 = vmul.f32 %v4507_v41, %v1254_v17  ;;  %v1273_v25 = vmul.f32 %v4508_v40, %v1254_v17  ;;  %v4512_v39 = vrot.slane %v3465_v21, %v2954_v14  ;;  %v4513_v40 = vrot.slane %v3468_v49, %v2954_v14 }
 0x13a   : > { %v1274_v31 = vmul.f32 %v4509_v47, %v1254_v17  ;;  %v1275_v38 = vmul.f32 %v4510_v15, %v1254_v17  ;;  %v3908_v35 = vmul.f32 %v4511_v16, %v1653_v32  ;;  %v1188_v3 = vadd.f32 %v1184_v57, %v1160_v29 }
 0x13b   : > { %v3913_v41 = vmul.f32 %v4512_v39, %v1653_v32  ;;  %v3918_v47 = vmul.f32 %v4513_v40, %v1653_v32  ;;  %v1189_v18 = vadd.f32 %v1185_v54, %v1161_v50  ;;  %v4514_v17 = vrot.slane %v3479_v20, %v2954_v14 }
 0x13c   : > { %v4515_v16 = vrot.slane %v3412_v28, %v2964_v19  ;;  %v1190_v39 = vadd.f32 %v1186_v51, %v1162_v56  ;;  %v1212_v40 = vmul.f32 %v4516_v33, %v3623_v10  ;;  %v4517_v57 = vrot.slane %v3316_v13, %v2909_v52 }
 0x13d   : > { %v3923_v15 = vmul.f32 %v4514_v17, %v1653_v32  ;;  %v4518_v32 = vrot.slane %v3323_v4, %v2909_v52  ;;  %v1191_v54 = vadd.f32 %v1187_v58, %v1163_v63  ;;  %v4519_v17 = vrot.slane %v3415_v36, %v2964_v19 }
 0x13e   : > { %v3900_v26 = vpop.permute.xlu1 %1708  ;;  %v3928_v45 = vmul.f32 %v4515_v16, %v1310_v0  ;;  %v1213_v29 = vmul.f32 %v4517_v57, %v3623_v10  ;;  %v4521_v22 = vrot.slane %v3421_v24, %v2964_v19  ;;  %v4523_v13 = vrot.slane %v3424_v1, %v2964_v19 }
 0x13f   : > { %v1214_v50 = vmul.f32 %v4518_v32, %v3623_v10  ;;  %v3945_v56 = vmul.f32 %v4519_v17, %v1310_v0  ;;  %v4525_v4 = vrot.slane %v3326_v60, %v2909_v52  ;;  %v4526_v63 = vrot.slane %v3412_v28, %v2924_v59 }
 0x140   : > { %v3950_v33 = vmul.f32 %v4521_v22, %v1310_v0  ;;  %v3955_v51 = vmul.f32 %v4523_v13, %v1310_v0  ;;  %v4527_v57 = vrot.slane %v3415_v36, %v2924_v59  ;;  %v4528_v0 = vrot.slane %v3421_v24, %v2924_v59  ;;  %v1398_v13 = vpop.permute.xlu0 %1397 }
 0x141   : > { %4520 = vst [vmem:[#allocation20_spill] sm:$0xff] %v3945_v56  ;;  %v1215_v58 = vmul.f32 %v4525_v4, %v3623_v10  ;;  %v1244_v16 = vmul.f32 %v4526_v63, %v3681_v62  ;;  %v4529_v60 = vrot.slane %v3599_v53, %v2940_v6  ;;  %v4531_v4 = vrot.slane %v3602_v37, %v2940_v6 }
 0x142   : > { %4522 = vst [vmem:[#allocation21_spill] sm:$0xff] %v3950_v33  ;;  %4524 = vst [vmem:[#allocation22_spill] sm:$0xff] %v3955_v51  ;;  %v1245_v32 = vmul.f32 %v4527_v57, %v3681_v62  ;;  %v1246_v17 = vmul.f32 %v4528_v0, %v3681_v62  ;;  %v4533_v57 = vrot.slane %v3608_v9, %v2940_v6 }
 0x143   : > { %v3973_v22 = vpop.permute.xlu1 %1341  ;;  %v3978_v10 = vmul.f32 %v4529_v60, %v1737_v42  ;;  %v3983_v63 = vmul.f32 %v4531_v4, %v1737_v42  ;;  %v4535_v0 = vrot.slane %v3611_v7, %v2940_v6  ;;  %v1216_v55 = vadd.f32 %v1212_v40, %v1188_v3  ;;  %v4538_v4 = vld [vmem:[#allocation18_spill] sm:$0xff] }
 0x144   : > { %v3988_v52 = vmul.f32 %v4533_v57, %v1737_v42  ;;  %v1217_v51 = vadd.f32 %v1213_v29, %v1189_v18  ;;  %v1218_v33 = vadd.f32 %v1214_v50, %v1190_v39  ;;  %v4537_v60 = vrot.slane %v3424_v1, %v2924_v59 }
 0x145   : > { %4530 = vst [vmem:[#allocation23_spill] sm:$0xff] %v3978_v10  ;;  %4532 = vst [vmem:[#allocation24_spill] sm:$0xff] %v3983_v63  ;;  %v3993_v11 = vmul.f32 %v4535_v0, %v1737_v42  ;;  %v4539_v63 = vrot.slane %v3462_v5, %v2940_v6  ;;  %v4540_v57 = vrot.slane %v3465_v21, %v2940_v6 }
 0x146   : > { %4534 = vst [vmem:[#allocation25_spill] sm:$0xff] %v3988_v52  ;;  %v1247_v10 = vmul.f32 %v4537_v60, %v3681_v62  ;;  %v4541_v18 = vrot.slane %v3468_v49, %v2940_v6  ;;  %v4542_v42 = vrot.slane %v3646_v34, %v2891_v44  ;;  %v1219_v62 = vadd.f32 %v1215_v58, %v1191_v54 }
 0x147   : > { %4536 = vst [vmem:[#allocation26_spill] sm:$0xff] %v3993_v11  ;;  %v1643_v56 = vmul.f32 %v4539_v63, %v4538_v4  ;;  %v1644_v52 = vmul.f32 %v4540_v57, %v4538_v4  ;;  %v1248_v40 = vadd.f32 %v1244_v16, %v1216_v55  ;;  %v1249_v29 = vadd.f32 %v1245_v32, %v1217_v51  ;;  %v4544_v63 = vld [vmem:[#allocation17_spill] sm:$0xff] }
 0x148   : > { %v1645_v3 = vmul.f32 %v4541_v18, %v4538_v4  ;;  %v4014_v39 = vmul.f32 %v4542_v42, %v1398_v13  ;;  %v1250_v50 = vadd.f32 %v1246_v17, %v1218_v33  ;;  %v4545_v0 = vrot.slane %v3462_v5, %v2924_v59  ;;  %v1370_v33 = vpop.permute.xlu1 %1369 }
 0x149   : > { %v4546_v57 = vrot.slane %v3465_v21, %v2924_v59  ;;  %v4547_v18 = vrot.slane %v3468_v49, %v2924_v59  ;;  %v4548_v55 = vrot.slane %v3479_v20, %v2940_v6  ;;  %v1251_v51 = vadd.f32 %v1247_v10, %v1219_v62 }
 0x14a   : > { %4543 = vst [vmem:[#allocation18_spill] sm:$0xff] %v4014_v39  ;;  %v1615_v60 = vmul.f32 %v4545_v0, %v4544_v63  ;;  %v4549_v58 = vrot.slane %v3479_v20, %v2924_v59  ;;  %v4550_v32 = vrot.slane %v3649_v2, %v2891_v44  ;;  %v4552_v0 = vrot.slane %v3652_v46, %v2891_v44 }
 0x14b   : > { %v1616_v11 = vmul.f32 %v4546_v57, %v4544_v63  ;;  %v1617_v42 = vmul.f32 %v4547_v18, %v4544_v63  ;;  %v1646_v54 = vmul.f32 %v4548_v55, %v4538_v4  ;;  %v4553_v10 = vrot.slane %v3412_v28, %v2954_v14 }
 0x14c   : > { %v1618_v16 = vmul.f32 %v4549_v58, %v4544_v63  ;;  %v4039_v17 = vmul.f32 %v4550_v32, %v1398_v13  ;;  %v4044_v57 = vmul.f32 %v4552_v0, %v1398_v13  ;;  %v1647_v18 = vadd.f32 %v1643_v56, %v1615_v60 }
 0x14d   : > { %v1648_v6 = vadd.f32 %v1644_v52, %v1616_v11  ;;  %v1649_v4 = vadd.f32 %v1645_v3, %v1617_v42  ;;  %v1300_v62 = vmul.f32 %v4553_v10, %v3809_v43  ;;  %v1276_v55 = vadd.f32 %v1272_v23, %v1248_v40 }
 0x14e   : > { %4551 = vst [vmem:[#allocation17_spill] sm:$0xff] %v4039_v17  ;;  %v1277_v63 = vadd.f32 %v1273_v25, %v1249_v29  ;;  %v1278_v58 = vadd.f32 %v1274_v31, %v1250_v50  ;;  %v4554_v32 = vrot.slane %v3663_v27, %v2891_v44  ;;  %v1650_v39 = vadd.f32 %v1646_v54, %v1618_v16  ;;  %v1765_v50 = vpop.permute.xlu1 %1764 }
 0x14f   : > { %v4555_v56 = vrot.slane %v3415_v36, %v2954_v14  ;;  %v4556_v11 = vrot.slane %v3421_v24, %v2954_v14  ;;  %v4557_v23 = vrot.slane %v3424_v1, %v2954_v14  ;;  %v1279_v31 = vadd.f32 %v1275_v38, %v1251_v51  ;;  %v1821_v51 = vpop.permute.xlu0 %1820 }
 0x150   : > { %v4053_v17 = vmul.f32 %v4554_v32, %v1398_v13  ;;  %v4558_v13 = vrot.slane %v3462_v5, %v2964_v19  ;;  %v4559_v36 = vrot.slane %v3465_v21, %v2964_v19  ;;  %v4560_v24 = vrot.slane %v3468_v49, %v2964_v19 }
 0x151   : > { %v1301_v52 = vmul.f32 %v4555_v56, %v3809_v43  ;;  %v1302_v28 = vmul.f32 %v4556_v11, %v3809_v43  ;;  %v1303_v25 = vmul.f32 %v4557_v23, %v3809_v43  ;;  %v1675_v1 = vadd.f32 %v3908_v35, %v1647_v18 }
 0x152   : > { %v1699_v3 = vmul.f32 %v4558_v13, %v3855_v61  ;;  %v1700_v40 = vmul.f32 %v4559_v36, %v3855_v61  ;;  %v1701_v29 = vmul.f32 %v4560_v24, %v3855_v61  ;;  %v1676_v43 = vadd.f32 %v3913_v41, %v1648_v6  ;;  %v1793_v32 = vpop.permute.xlu1 %1792  ;;  %v4573_v24 = vld [vmem:[#allocation20_spill] sm:$0xff] }
 0x153   : > { %v1677_v38 = vadd.f32 %v3918_v47, %v1649_v4  ;;  %v1304_v60 = vadd.f32 %v1300_v62, %v1276_v55  ;;  %v4561_v5 = vrot.slane %v3479_v20, %v2964_v19  ;;  %v4562_v21 = vrot.slane %v3599_v53, %v2924_v59 }
 0x154   : > { %v4563_v49 = vrot.slane %v3602_v37, %v2924_v59  ;;  %v4564_v41 = vrot.slane %v3608_v9, %v2924_v59  ;;  %v1678_v16 = vadd.f32 %v3923_v15, %v1650_v39  ;;  %v1305_v20 = vadd.f32 %v1301_v52, %v1277_v63 }
 0x155   : > { %v1702_v42 = vmul.f32 %v4561_v5, %v3855_v61  ;;  %v1727_v54 = vmul.f32 %v4562_v21, %v3900_v26  ;;  %v1306_v61 = vadd.f32 %v1302_v28, %v1278_v58  ;;  %v1307_v0 = vadd.f32 %v1303_v25, %v1279_v31 }
 0x156   : > { %v1728_v35 = vmul.f32 %v4563_v49, %v3900_v26  ;;  %v1729_v47 = vmul.f32 %v4564_v41, %v3900_v26  ;;  %v1703_v18 = vadd.f32 %v1699_v3, %v1675_v1  ;;  %v1704_v6 = vadd.f32 %v1700_v40, %v1676_v43  ;;  %v4574_v1 = vld [vmem:[#allocation21_spill] sm:$0xff] }
 0x157   : > { %v1705_v4 = vadd.f32 %v1701_v29, %v1677_v38  ;;  %v4565_v10 = vrot.slane %v3611_v7, %v2924_v59  ;;  %v1332_v55 = vadd.f32 %v3928_v45, %v1304_v60  ;;  %v4566_v56 = vrot.slane %v3760_v12, %v2901_v48  ;;  %v4575_v38 = vld [vmem:[#allocation22_spill] sm:$0xff] }
 0x158   : > { %v4567_v15 = vrot.slane %v3763_v30, %v2901_v48  ;;  %v4568_v63 = vrot.slane %v3784_v8, %v2901_v48  ;;  %v1706_v59 = vadd.f32 %v1702_v42, %v1678_v16  ;;  %v1732_v52 = vadd.f32 %v1728_v35, %v1704_v6  ;;  %v4576_v42 = vld [vmem:[#allocation16_spill] sm:$0xff]  ;;  %v4583_v6 = vld [vmem:[#allocation25_spill] sm:$0xff] }
 0x159   : > { %v1730_v62 = vmul.f32 %v4565_v10, %v3900_v26  ;;  %v4107_v11 = vmul.f32 %v4566_v56, %v1821_v51  ;;  %v1731_v26 = vadd.f32 %v1727_v54, %v1703_v18  ;;  %v1733_v45 = vadd.f32 %v1729_v47, %v1705_v4  ;;  %v4584_v10 = vld [vmem:[#allocation19_spill] sm:$0xff] }
 0x15a   : > { %v4112_v39 = vmul.f32 %v4567_v15, %v1821_v51  ;;  %v4117_v58 = vmul.f32 %v4568_v63, %v1821_v51  ;;  %v4569_v28 = vrot.slane %v3646_v34, %v2901_v48  ;;  %v4570_v25 = vrot.slane %v3649_v2, %v2901_v48  ;;  %v1426_v15 = vpop.permute.xlu1 %1425 }
 0x15b   : > { %v4571_v13 = vrot.slane %v3652_v46, %v2901_v48  ;;  %v4572_v36 = vrot.slane %v3663_v27, %v2901_v48  ;;  %v1333_v29 = vadd.f32 %v4573_v24, %v1305_v20  ;;  %v1334_v43 = vadd.f32 %v4574_v1, %v1306_v61  ;;  %v4581_v20 = vld [vmem:[#allocation23_spill] sm:$0xff] }
 0x15c   : > { %v1360_v23 = vmul.f32 %v4569_v28, %v3973_v22  ;;  %v1361_v31 = vmul.f32 %v4570_v25, %v3973_v22  ;;  %v1335_v60 = vadd.f32 %v4575_v38, %v1307_v0  ;;  %v1734_v5 = vadd.f32 %v1730_v62, %v1706_v59  ;;  %v4582_v0 = vld [vmem:[#allocation24_spill] sm:$0xff] }
 0x15d   : > { %v1362_v3 = vmul.f32 %v4571_v13, %v3973_v22  ;;  %v1363_v40 = vmul.f32 %v4572_v36, %v3973_v22  ;;  %v4577_v21 = vrot.slane %v3646_v34, %v4576_v42  ;;  %v4578_v49 = vrot.slane %v3649_v2, %v4576_v42  ;;  %v4586_v13 = vld [vmem:[#allocation26_spill] sm:$0xff] }
 0x15e   : > { %v4579_v41 = vrot.slane %v3652_v46, %v4576_v42  ;;  %v4580_v22 = vrot.slane %v3663_v27, %v4576_v42  ;;  %v1759_v61 = vadd.f32 %v4581_v20, %v1731_v26  ;;  %v1760_v18 = vadd.f32 %v4582_v0, %v1732_v52  ;;  %v1849_v20 = vpop.permute.xlu1 %1848 }
 0x15f   : > { %v1388_v54 = vmul.f32 %v4577_v21, %v1370_v33  ;;  %v1389_v35 = vmul.f32 %v4578_v49, %v1370_v33  ;;  %v1761_v4 = vadd.f32 %v4583_v6, %v1733_v45  ;;  %v4585_v62 = vrot.slane %v4584_v10, %v2901_v48 }
 0x160   : > { %v1390_v47 = vmul.f32 %v4579_v41, %v1370_v33  ;;  %v1391_v16 = vmul.f32 %v4580_v22, %v1370_v33  ;;  %v1364_v63 = vadd.f32 %v1360_v23, %v1332_v55  ;;  %v1365_v59 = vadd.f32 %v1361_v31, %v1333_v29 }
 0x161   : > { %v1842_v56 = vmul.f32 %v4585_v62, %v1821_v51  ;;  %v1366_v28 = vadd.f32 %v1362_v3, %v1334_v43  ;;  %v1367_v25 = vadd.f32 %v1363_v40, %v1335_v60  ;;  %v1762_v36 = vadd.f32 %v4586_v13, %v1734_v5 }
 0x162   : > { %v4587_v33 = vrot.slane %v3599_v53, %v2954_v14  ;;  %v4588_v26 = vrot.slane %v3602_v37, %v2954_v14  ;;  %v4589_v45 = vrot.slane %v3608_v9, %v2954_v14  ;;  %v1392_v51 = vadd.f32 %v1388_v54, %v1364_v63  ;;  %v4594_v54 = vld [vmem:[#allocation15_spill] sm:$0xff] }
 0x163   : > { %v1393_v38 = vadd.f32 %v1389_v35, %v1365_v59  ;;  %v1394_v55 = vadd.f32 %v1390_v47, %v1366_v28  ;;  %v1395_v23 = vadd.f32 %v1391_v16, %v1367_v25  ;;  %v4590_v31 = vrot.slane %v3611_v7, %v2954_v14  ;;  %v4600_v59 = vld [vmem:[#allocation18_spill] sm:$0xff] }
 0x164   : > { %v1783_v24 = vmul.f32 %v4587_v33, %v1765_v50  ;;  %v1784_v52 = vmul.f32 %v4588_v26, %v1765_v50  ;;  %v1785_v1 = vmul.f32 %v4589_v45, %v1765_v50  ;;  %v4591_v40 = vrot.slane %v3599_v53, %v2964_v19  ;;  %v1877_v45 = vpop.permute.xlu0 %1876 }
 0x165   : > { %v1786_v3 = vmul.f32 %v4590_v31, %v1765_v50  ;;  %v4592_v43 = vrot.slane %v3602_v37, %v2964_v19  ;;  %v4593_v5 = vrot.slane %v3608_v9, %v2964_v19  ;;  %v4595_v49 = vrot.slane %v3646_v34, %v4594_v54 }
 0x166   : > { %v1811_v29 = vmul.f32 %v4591_v40, %v1793_v32  ;;  %v4596_v14 = vrot.slane %v3649_v2, %v4594_v54  ;;  %v4597_v41 = vrot.slane %v3652_v46, %v4594_v54  ;;  %v4598_v22 = vrot.slane %v3663_v27, %v4594_v54  ;;  %v4601_v2 = vld [vmem:[#allocation17_spill] sm:$0xff] }
 0x167   : > { %v1812_v60 = vmul.f32 %v4592_v43, %v1793_v32  ;;  %v1813_v21 = vmul.f32 %v4593_v5, %v1793_v32  ;;  %v1444_v35 = vmul.f32 %v4595_v49, %v1426_v15  ;;  %v1787_v0 = vadd.f32 %v1783_v24, %v1759_v61 }
 0x168   : > { %v1445_v50 = vmul.f32 %v4596_v14, %v1426_v15  ;;  %v1446_v47 = vmul.f32 %v4597_v41, %v1426_v15  ;;  %v1447_v16 = vmul.f32 %v4598_v22, %v1426_v15  ;;  %v1788_v6 = vadd.f32 %v1784_v52, %v1760_v18 }
 0x169   : > { %v1789_v62 = vadd.f32 %v1785_v1, %v1761_v4  ;;  %v4599_v34 = vrot.slane %v3611_v7, %v2964_v19  ;;  %v1420_v28 = vadd.f32 %v4600_v59, %v1392_v51  ;;  %v1421_v25 = vadd.f32 %v4601_v2, %v1393_v38  ;;  %v1455_v51 = vpop.permute.xlu1 %1454 }
 0x16a   : > { %v1422_v13 = vadd.f32 %v4044_v57, %v1394_v55  ;;  %v1423_v46 = vadd.f32 %v4053_v17, %v1395_v23  ;;  %v1790_v33 = vadd.f32 %v1786_v3, %v1762_v36  ;;  %v1815_v26 = vadd.f32 %v1811_v29, %v1787_v0 }
 0x16b   : > { %v1814_v63 = vmul.f32 %v4599_v34, %v1793_v32  ;;  %v1816_v27 = vadd.f32 %v1812_v60, %v1788_v6  ;;  %v1817_v15 = vadd.f32 %v1813_v21, %v1789_v62  ;;  %v1448_v61 = vadd.f32 %v1444_v35, %v1420_v28 }
 0x16c   : > { %v1449_v18 = vadd.f32 %v1445_v50, %v1421_v25  ;;  %v1450_v4 = vadd.f32 %v1446_v47, %v1422_v13  ;;  %v1451_v24 = vadd.f32 %v1447_v16, %v1423_v46  ;;  %v4602_v19 = vrot.slane %v3760_v12, %v4576_v42 }
 0x16d   : > { %v1818_v52 = vadd.f32 %v1814_v63, %v1790_v33  ;;  %v4603_v1 = vrot.slane %v3763_v30, %v4576_v42  ;;  %v4604_v17 = vrot.slane %v3784_v8, %v4576_v42  ;;  %v1457_v38 = vadd.f32 %v1455_v51, %v1448_v61  ;;  %v1905_v34 = vpop.permute.xlu1 %1904 }
 0x16e   : > { %v1867_v32 = vmul.f32 %v4602_v19, %v1849_v20  ;;  %v1458_v55 = vadd.f32 %v1455_v51, %v1449_v18  ;;  %v1459_v23 = vadd.f32 %v1455_v51, %v1450_v4  ;;  %v1460_v31 = vadd.f32 %v1455_v51, %v1451_v24  ;;  %v1472_v18 = vpop.permute.xlu0 %1471 }
 0x16f   : > { %v1868_v57 = vmul.f32 %v4603_v1, %v1849_v20  ;;  %v1869_v36 = vmul.f32 %v4604_v17, %v1849_v20  ;;  %v1843_v3 = vadd.f32 %v4107_v11, %v1815_v26  ;;  %v4605_v40 = vrot.slane %v4584_v10, %v4576_v42 }
 0x170   : > { %v4606_v43 = vrot.slane %v3760_v12, %v2891_v44  ;;  %v1922_v5 = vrot.slane %v4584_v10, %v4594_v54  ;;  %v1844_v21 = vadd.f32 %v4112_v39, %v1816_v27  ;;  %v1845_v49 = vadd.f32 %v4117_v58, %v1817_v15 }
 0x171   : > { %v1870_v29 = vmul.f32 %v4605_v40, %v1849_v20  ;;  %v1461_v35 = vmul.f32 0.01, %v1457_v38  ;;  %v1462_v14 = vmul.f32 0.01, %v1458_v55  ;;  %v1846_v50 = vadd.f32 %v1842_v56, %v1818_v52  ;;  %v1934_v24 = vpop.permute.xlu1 %1933 }
 0x172   : > { %v1895_v60 = vmul.f32 %v4606_v43, %v1877_v45  ;;  %v4607_v11 = vrot.slane %v3763_v30, %v2891_v44  ;;  %v1463_v47 = vmul.f32 0.01, %v1459_v23  ;;  %v1464_v22 = vmul.f32 0.01, %v1460_v31 }
 0x173   : > { %v1871_v16 = vadd.f32 %v1867_v32, %v1843_v3  ;;  %v1872_v20 = vadd.f32 %v1868_v57, %v1844_v21  ;;  %v1873_v0 = vadd.f32 %v1869_v36, %v1845_v49  ;;  %v4608_v6 = vrot.slane %v3784_v8, %v2891_v44 }
 0x174   : > { %v1896_v41 = vmul.f32 %v4607_v11, %v1877_v45  ;;  %v1874_v39 = vadd.f32 %v1870_v29, %v1846_v50  ;;  %v4609_v58 = vrot.slane %v4584_v10, %v2891_v44  ;;  %v1465_v56 = vmax.f32 %v1457_v38, %v1461_v35  ;;  %v1556_v29 = vpop.permute.xlu0 %1555 }
 0x175   : > { %v1897_v62 = vmul.f32 %v4608_v6, %v1877_v45  ;;  %v4226_v59 = vmax.f32 %v1458_v55, %v1462_v14  ;;  %v4610_v28 = vrot.slane %v3760_v12, %v4594_v54  ;;  %v4611_v25 = vrot.slane %v3763_v30, %v4594_v54 }
 0x176   : > { %v1898_v63 = vmul.f32 %v4609_v58, %v1877_v45  ;;  %v4612_v46 = vrot.slane %v3784_v8, %v4594_v54  ;;  %v4237_v26 = vmax.f32 %v1459_v23, %v1463_v47  ;;  %v4239_v27 = vmax.f32 %v1460_v31, %v1464_v22 }
 0x177   : > { %v1923_v2 = vmul.f32 %v4610_v28, %v1905_v34  ;;  %v1924_v13 = vmul.f32 %v4611_v25, %v1905_v34  ;;  %v1926_v10 = vmul.f32 %v1922_v5, %v1905_v34  ;;  %v1899_v15 = vadd.f32 %v1895_v60, %v1871_v16  ;;  %v1500_v60 = vpop.permute.xlu1 %1499 }
 0x178   : > { %v1925_v33 = vmul.f32 %v4612_v46, %v1905_v34  ;;  %v1900_v45 = vadd.f32 %v1896_v41, %v1872_v20  ;;  %v1901_v61 = vadd.f32 %v1897_v62, %v1873_v0  ;;  %v1902_v4 = vadd.f32 %v1898_v63, %v1874_v39 }
 0x179   : > { %v1477_v12 = vrot.slane %v1465_v56, %v2901_v48  ;;  %v1481_v30 = vrot.slane %v4226_v59, %v2901_v48  ;;  %v1927_v52 = vadd.f32 %v1923_v2, %v1899_v15  ;;  %v1485_v32 = vrot.slane %v4237_v26, %v2901_v48 }
 0x17a   : > { %v1928_v19 = vadd.f32 %v1924_v13, %v1900_v45  ;;  %v1929_v8 = vadd.f32 %v1925_v33, %v1901_v61  ;;  %v1489_v1 = vrot.slane %v4239_v27, %v2901_v48  ;;  %v1561_v57 = vrot.slane %v1465_v56, %v4594_v54 }
 0x17b   : > { %v1930_v17 = vadd.f32 %v1926_v10, %v1902_v4  ;;  %v1565_v36 = vrot.slane %v4226_v59, %v4594_v54  ;;  %v1936_v51 = vadd.f32 %v1934_v24, %v1927_v52  ;;  %v1490_v23 = vmul.f32 %v1477_v12, %v1472_v18  ;;  %v1528_v46 = vpop.permute.xlu1 %1527 }
 0x17c   : > { %v1937_v38 = vadd.f32 %v1934_v24, %v1928_v19  ;;  %v1938_v55 = vadd.f32 %v1934_v24, %v1929_v8  ;;  %v1491_v31 = vmul.f32 %v1481_v30, %v1472_v18  ;;  %v1569_v3 = vrot.slane %v4237_v26, %v4594_v54 }
 0x17d   : > { %v1939_v40 = vadd.f32 %v1934_v24, %v1930_v17  ;;  %v1940_v43 = vmul.f32 0.01, %v1936_v51  ;;  %v1505_v5 = vrot.slane %v1465_v56, %v4576_v42  ;;  %v1509_v21 = vrot.slane %v4226_v59, %v4576_v42 }
 0x17e   : > { %v1513_v49 = vrot.slane %v4237_v26, %v4576_v42  ;;  %v1941_v35 = vmul.f32 0.01, %v1937_v38  ;;  %v1942_v14 = vmul.f32 0.01, %v1938_v55  ;;  %v1517_v11 = vrot.slane %v4239_v27, %v4576_v42 }
 0x17f   : > { %v1943_v50 = vmul.f32 0.01, %v1939_v40  ;;  %v1492_v41 = vmul.f32 %v1485_v32, %v1472_v18  ;;  %v1518_v47 = vmul.f32 %v1505_v5, %v1500_v60  ;;  %v1519_v22 = vmul.f32 %v1509_v21, %v1500_v60  ;;  %v1951_v8 = vpop.permute.xlu1 %1950 }
 0x180   : > { %v1520_v16 = vmul.f32 %v1513_v49, %v1500_v60  ;;  %v1493_v20 = vmul.f32 %v1489_v1, %v1472_v18  ;;  %v1573_v0 = vrot.slane %v4239_v27, %v4594_v54  ;;  %v1574_v6 = vmul.f32 %v1561_v57, %v1556_v29 }
 0x181   : > { %v1521_v62 = vmul.f32 %v1517_v11, %v1500_v60  ;;  %v1533_v34 = vrot.slane %v1465_v56, %v2891_v44  ;;  %v1537_v39 = vrot.slane %v4226_v59, %v2891_v44  ;;  %v1541_v58 = vrot.slane %v4237_v26, %v2891_v44 }
 0x182   : > { %v1545_v63 = vrot.slane %v4239_v27, %v2891_v44  ;;  %v4269_v28 = vmax.f32 %v1936_v51, %v1940_v43  ;;  %v4271_v2 = vmax.f32 %v1937_v38, %v1941_v35  ;;  %v4273_v25 = vmax.f32 %v1938_v55, %v1942_v14 }
 0x183   : > { %v4275_v13 = vmax.f32 %v1939_v40, %v1943_v50  ;;  %v1522_v33 = vadd.f32 %v1518_v47, %v1490_v23  ;;  %v1523_v56 = vadd.f32 %v1519_v22, %v1491_v31  ;;  %v1524_v10 = vadd.f32 %v1520_v16, %v1492_v41  ;;  %v1979_v47 = vpop.permute.xlu1 %1978 }
 0x184   : > { %v1546_v15 = vmul.f32 %v1533_v34, %v1528_v46  ;;  %v1525_v59 = vadd.f32 %v1521_v62, %v1493_v20  ;;  %v1547_v45 = vmul.f32 %v1537_v39, %v1528_v46  ;;  %v1548_v61 = vmul.f32 %v1541_v58, %v1528_v46 }
 0x185   : > { %v1549_v26 = vmul.f32 %v1545_v63, %v1528_v46  ;;  %v1575_v18 = vmul.f32 %v1565_v36, %v1556_v29  ;;  %v1576_v4 = vmul.f32 %v1569_v3, %v1556_v29  ;;  %v1577_v27 = vmul.f32 %v1573_v0, %v1556_v29 }
 0x186   : > { %v1550_v12 = vadd.f32 %v1546_v15, %v1522_v33  ;;  %v1551_v30 = vadd.f32 %v1547_v45, %v1523_v56  ;;  %v1552_v24 = vadd.f32 %v1548_v61, %v1524_v10  ;;  %v1956_v19 = vrot.slane %v4269_v28, %v2901_v48 }
 0x187   : > { %v1553_v52 = vadd.f32 %v1549_v26, %v1525_v59  ;;  %v1960_v1 = vrot.slane %v4271_v2, %v2901_v48  ;;  %v1964_v57 = vrot.slane %v4273_v25, %v2901_v48  ;;  %v1968_v17 = vrot.slane %v4275_v13, %v2901_v48  ;;  %v2007_v48 = vpop.permute.xlu0 %2006  ;;  %v2035_v15 = vpop.permute.xlu1 %2034 }
 0x188   : > { %v1578_v32 = vadd.f32 %v1574_v6, %v1550_v12  ;;  %v1579_v36 = vadd.f32 %v1575_v18, %v1551_v30  ;;  %v1580_v51 = vadd.f32 %v1576_v4, %v1552_v24  ;;  %v1969_v55 = vmul.f32 %v1956_v19, %v1951_v8 }
 0x189   : > { %v1581_v38 = vadd.f32 %v1577_v27, %v1553_v52  ;;  %v1970_v23 = vmul.f32 %v1960_v1, %v1951_v8  ;;  %v1971_v31 = vmul.f32 %v1964_v57, %v1951_v8  ;;  %v1972_v3 = vmul.f32 %v1968_v17, %v1951_v8 }
 0x18a   : > { %v2012_v40 = vrot.slane %v4269_v28, %v2891_v44  ;;  %v2016_v29 = vrot.slane %v4271_v2, %v2891_v44  ;;  %v2020_v43 = vrot.slane %v4273_v25, %v2891_v44  ;;  %v2024_v60 = vrot.slane %v4275_v13, %v2891_v44 }
 0x18b   : > { %v1984_v5 = vrot.slane %v4269_v28, %v4576_v42  ;;  %v1988_v21 = vrot.slane %v4271_v2, %v4576_v42  ;;  %v1992_v49 = vrot.slane %v4273_v25, %v4576_v42  ;;  %v1996_v35 = vrot.slane %v4275_v13, %v4576_v42 }
 0x18c   : > { %v1973_v14 = vadd.f32 %v1969_v55, %v1578_v32  ;;  %v1974_v50 = vadd.f32 %v1970_v23, %v1579_v36  ;;  %v1975_v11 = vadd.f32 %v1971_v31, %v1580_v51  ;;  %v1976_v41 = vadd.f32 %v1972_v3, %v1581_v38 }
 0x18d   : > { %v1997_v22 = vmul.f32 %v1984_v5, %v1979_v47  ;;  %v1998_v44 = vmul.f32 %v1988_v21, %v1979_v47  ;;  %v1999_v16 = vmul.f32 %v1992_v49, %v1979_v47  ;;  %v2000_v20 = vmul.f32 %v1996_v35, %v1979_v47 }
 0x18e   : > { %v2025_v0 = vmul.f32 %v2012_v40, %v2007_v48  ;;  %v2026_v6 = vmul.f32 %v2016_v29, %v2007_v48  ;;  %v2027_v62 = vmul.f32 %v2020_v43, %v2007_v48  ;;  %v2028_v34 = vmul.f32 %v2024_v60, %v2007_v48  ;;  %v2097_v40 = vpop.permute.xlu0 %2096 }
 0x18f   : > { %v2001_v39 = vadd.f32 %v1997_v22, %v1973_v14  ;;  %v2002_v58 = vadd.f32 %v1998_v44, %v1974_v50  ;;  %v2003_v63 = vadd.f32 %v1999_v16, %v1975_v11  ;;  %v2004_v46 = vadd.f32 %v2000_v20, %v1976_v41 }
 0x190   : > { %v2040_v42 = vrot.slane %v4269_v28, %v4594_v54  ;;  %v2044_v33 = vrot.slane %v4271_v2, %v4594_v54  ;;  %v2048_v56 = vrot.slane %v4273_v25, %v4594_v54  ;;  %v2052_v10 = vrot.slane %v4275_v13, %v4594_v54  ;;  %v2064_v2 = vpop.permute.xlu1 %2063 }
 0x191   : > { %v2029_v59 = vadd.f32 %v2025_v0, %v2001_v39  ;;  %v2030_v45 = vadd.f32 %v2026_v6, %v2002_v58  ;;  %v2031_v61 = vadd.f32 %v2027_v62, %v2003_v63  ;;  %v2032_v26 = vadd.f32 %v2028_v34, %v2004_v46 }
 0x192   : > { %v2053_v18 = vmul.f32 %v2040_v42, %v2035_v15  ;;  %v2054_v4 = vmul.f32 %v2044_v33, %v2035_v15  ;;  %v2055_v27 = vmul.f32 %v2048_v56, %v2035_v15  ;;  %v2056_v12 = vmul.f32 %v2052_v10, %v2035_v15 }
 0x193   : > { %v2082_v54 = vrot.slane %v3599_v53, 4  ;;  %v2083_v13 = vrot.slane %v3602_v37, 4  ;;  %v2084_v1 = vrot.slane %v3608_v9, 4  ;;  %v2085_v38 = vrot.slane %v3611_v7, 4 }
 0x194   : > { %v2057_v30 = vadd.f32 %v2053_v18, %v2029_v59  ;;  %v2058_v28 = vadd.f32 %v2054_v4, %v2030_v45  ;;  %v2059_v24 = vadd.f32 %v2055_v27, %v2031_v61  ;;  %v2060_v52 = vadd.f32 %v2056_v12, %v2032_v26  ;;  %v2106_v5 = vpop.permute.xlu1 %2105 }
 0x196   : > { %v2066_v19 = vadd.f32 %v2064_v2, %v2057_v30  ;;  %v2067_v8 = vadd.f32 %v2064_v2, %v2058_v28  ;;  %v2068_v25 = vadd.f32 %v2064_v2, %v2059_v24  ;;  %v2069_v32 = vadd.f32 %v2064_v2, %v2060_v52 }
 0x198   : > { %v2070_v57 = vmul.f32 0.01, %v2066_v19  ;;  %v2071_v17 = vmul.f32 0.01, %v2067_v8  ;;  %v2072_v36 = vmul.f32 0.01, %v2068_v25 }
 0x199   : > { %v2073_v51 = vmul.f32 0.01, %v2069_v32 }
 0x19a   : > { %v2074_v55 = vmax.f32 %v2066_v19, %v2070_v57  ;;  %v2075_v23 = vmax.f32 %v2067_v8, %v2071_v17  ;;  %v2076_v31 = vmax.f32 %v2068_v25, %v2072_v36 }
 0x19b   : > { %v2077_v3 = vmax.f32 %v2069_v32, %v2073_v51 }
 0x19c   : > { %v2090_v29 = vadd.f32 %v2082_v54, %v2074_v55  ;;  %v2091_v53 = vadd.f32 %v2083_v13, %v2075_v23  ;;  %v2092_v43 = vadd.f32 %v2084_v1, %v2076_v31 }
 0x19d   : > { %v2093_v37 = vadd.f32 %v2085_v38, %v2077_v3 }
 0x19e   : > { %v2099_v60 = vmul.f32 %v2097_v40, %v2090_v29  ;;  %v2100_v9 = vmul.f32 %v2097_v40, %v2091_v53  ;;  %v2101_v48 = vmul.f32 %v2097_v40, %v2092_v43 }
 0x19f   : > { %v2102_v21 = vmul.f32 %v2097_v40, %v2093_v37 }
 0x1a0   : > { %v2108_v49 = vadd.f32 %v2106_v5, %v2099_v60  ;;  %v2109_v35 = vadd.f32 %v2106_v5, %v2100_v9  ;;  %v2110_v7 = vadd.f32 %v2106_v5, %v2101_v48 }
 0x1a1   : > { %v2111_v14 = vadd.f32 %v2106_v5, %v2102_v21 }
 0x1a2   : > { %v2112_v50 = vmul.f32 0.01, %v2108_v49  ;;  %v2113_v11 = vmul.f32 0.01, %v2109_v35  ;;  %v2114_v41 = vmul.f32 0.01, %v2110_v7 }
 0x1a3   : > { %v2115_v47 = vmul.f32 0.01, %v2111_v14 }
 0x1a4   : > { %v2116_v22 = vmax.f32 %v2108_v49, %v2112_v50  ;;  %v2117_v44 = vmax.f32 %v2109_v35, %v2113_v11  ;;  %v2118_v16 = vmax.f32 %v2110_v7, %v2114_v41 }
 0x1a5   : > { %v2119_v20 = vmax.f32 %v2111_v14, %v2115_v47 }
 0x1a6   : > { %v2124_v0 = vcombine.low %v2116_v22, %v2117_v44 }
 0x1a7   : > { %v2125_v6 = vcombine.low %v2118_v16, %v2119_v20 }
 0x1a8   : > { %2128 = vst [vmem:[%s395_s24] sm:$0xff] %v2124_v0 }
 0x1a9   : > { %2129 = vst [vmem:[%s395_s24 + $0x8] sm:$0xff] %v2125_v6 }
 0x1aa   : > { %2471 = shalt.err (!%p2468_p4)
}
 0x1ab   : > { %s2472_s17 = scalar_lea.hbm %s4319_s25, 256  ;;  %s2476_s13 = scalar_lea.hbm %s4615_s28, 1024 }
 0x1ac   : > { %p2473_p6 = scmp.ne.s32.totalorder %s4319_s25, %s2472_s17  ;;  %p2477_p1 = scmp.lt.u32.totalorder %s4319_s25, %s4615_s28 }
 0x1ad   : > { %p2478_p3 = scmp.lt.u32.totalorder %s2476_s13, %s2472_s17  ;;  %p2480_p8 = scmp.lt.u32.totalorder %s2472_s17, %s4319_s25 }
 0x1ae   : > { %p2474_p7 = pnand %p2473_p6, %p4616_p9 }
 0x1af   : > { %p2479_p5 = por %p2478_p3, %p2477_p1 }
 0x1b0   : > { %p2475_p10 = pneg %p2474_p7 }
 0x1b1   : > { %p2481_p12 = por %p2480_p8, %p2479_p5 }
 0x1b3   : > { %p2482_p0 = pnand %p2481_p12, %p2475_p10 }
 0x1b5   : > { %2485 = shalt.err (!%p2482_p0)
}
 0x1b6   : > { %2253 = dma.vmem_to_hbm [thread:$0]  (%p4616_p9), %s4321_s12, 256, %s4319_s25, %s2131_s27  }
 0x1b7 PF: > { %s4617_s30 = sld [smem:[#allocation8_spill]]  ;;  %s4618_s21 = sld [smem:[#allocation14_spill]] }
 0x1b8   : > { %p2264_p11 = scmp.ge.s32.totalorder %s2556_s20, 2 }
 0x1bd   : > { %s2159_s22 = sand.u32 1, %s4617_s30   ;;  %p4619_p13 = scmp.ne.s32.totalorder %s4618_s21, 0 }
 0x1be   : > { %s2160_s26 = scalar_lea.sflag [#allocation4], %s2159_s22 }
 0x1bf   : > { %p2260_p2 = pnand %p2264_p11, %p4619_p13 }
 0x1c1   : > { %2523 = dma.done.wait (!%p2260_p2), %s2160_s26, 256  }
 0x1c2   : > { %2525 = vsyncadd (!%p2260_p2), %s2160_s26, 4294967040  ;;  %s26_s20 = sadd.s32 1, %s2556_s20   ;;  %s4620_s17 = sld [smem:[#allocation11_spill]] }
 0x1c3   : > { %p23_p4 = scmp.ge.s32.totalorder %s26_s20, 6   ;;  %s4621_s29 = sld [smem:[#allocation12_spill]] }
 0x1c4   : > { %s4622_s19 = sld [smem:[#allocation13_spill]]  ;;  %s4623_s13 = smov %s2532_s14 }
 0x1c5   : > { %s4624_s14 = smov %s2536_s15  ;;  %s4625_s15 = smov %s2732_s23 }
 0x1c6   : > { %s4626_s16 = smov %s2548_s18  ;;  %25 = sbr.rel (!%p23_p4) target bundleno = 9 (0x9), region = 105 }
 0x1c9   : > { %s4627_s18 = smov %s4621_s29 }
 0x1cd   :  { %2165 = vsyncpa [#allocation3], 1 }
 0x1ce   :  { %2167 = vsyncpa [#allocation3 + $0x1], 1 }
 0x1cf   :  { %2168 = vsyncpa [#allocation4], 1 }
 0x1d0   :  { %2170 = vsyncpa [#allocation4 + $0x1], 1 }

</bundles_post_ra>
